<compile_context>
chip_gen: v5e
topology: v5e:2x2
jax: 0.10.0
libtpu: 0.0.40
codegen_flags: <defaults>
</compile_context>

<pallas_src>
import functools

import jax
import jax.numpy as jnp
from jax.experimental import pallas as pl
from jax.experimental.pallas import tpu as pltpu


def _round_up(n, m):
    return ((n + m - 1) // m) * m


def _default_pack_factor():
    """g=4 for 256-wide MXUs (v6e/v7x), g=2 for 128-wide MXUs (v4/v5)."""
    try:
        kind = jax.devices()[0].device_kind.lower()
    except Exception:
        return 4
    return 2 if ("v4" in kind or "v5" in kind) else 4


def _appearance_decoder_kernel(
    x_ref,              # (TR, g*n_feat)  f32   (packed rows)
    w1_ref, b1_ref,     # (g*n_feat, g*H) cdt,  (1, g*H) f32
    w2_ref, b2_ref,     # (g*H, g*H)  cdt,      (1, g*H) f32
    wsh_ref, bsh_ref,   # (g*H, g*48) cdt,      (1, g*48) f32
    wop_ref, bop_ref,   # (g*H, g)    cdt,      (1, g) f32
    shs_ref,            # (TR, g*48) f32
    op_ref,             # (TR, g)    f32
    *,
    approx_gelu: bool,
):
    cdt = w1_ref.dtype

    # In-kernel cast of x (removes the wrapper astype HBM pass).
    x = x_ref[...].astype(cdt)

    # Linear 1 + GELU  (MXU matmul, f32 accumulation; bias + GELU in f32 ->
    # safe on v5e's f32-only VPU/EUP and hidden under MXU slack elsewhere).
    h = jnp.dot(x, w1_ref[...], preferred_element_type=jnp.float32)
    h = jax.nn.gelu(h + b1_ref[...], approximate=approx_gelu)

    # Linear 2 + GELU
    h = jnp.dot(h.astype(cdt), w2_ref[...], preferred_element_type=jnp.float32)
    h = jax.nn.gelu(h + b2_ref[...], approximate=approx_gelu)
    hc = h.astype(cdt)

    # shs head: packed lane-dense output, no masking / no wrapper slice.
    shs = jnp.dot(hc, wsh_ref[...], preferred_element_type=jnp.float32) + bsh_ref[...]
    shs_ref[...] = shs.astype(shs_ref.dtype)

    # opacity head: sigmoid only on the g opacity columns.
    op = jnp.dot(hc, wop_ref[...], preferred_element_type=jnp.float32) + bop_ref[...]
    op_ref[...] = jax.nn.sigmoid(op).astype(op_ref.dtype)


def appearance_decoder(x, params, *, tile_m=8192, pack=None,
                       compute_dtype=jnp.bfloat16, approx_gelu=True):
    """x: [N, n_features] float32.  params: dict of f32 weights/biases."""
    N, n_feat = x.shape
    H = params["w1"].shape[1]
    n_shs = params["wsh"].shape[1]
    g = _default_pack_factor() if pack is None else pack
    f32 = jnp.float32

    # ---- block-diagonal weight packing (done per call here; cache in real use) ----
    eye = jnp.eye(g, dtype=f32)

    def bdiag(w):                      # [k, n] -> block-diag [g*k, g*n]
        return jnp.kron(eye, w.astype(f32)).astype(compute_dtype)

    def tile_b(b):                     # [1, n] (or [n]) -> [1, g*n] f32
        return jnp.tile(b.astype(f32).reshape(1, -1), (1, g))

    w1, b1 = bdiag(params["w1"]), tile_b(params["b1"])
    w2, b2 = bdiag(params["w2"]), tile_b(params["b2"])
    wsh, bsh = bdiag(params["wsh"]), tile_b(params["bsh"])
    wop, bop = bdiag(params["wop"]), tile_b(params["bop"])

    # ---- pack rows: [N, n_feat] -> [N/g, g*n_feat]  (free reshape; pad only
    #      the <g remainder rows when N % g != 0) ----
    n_pad = _round_up(N, g)
    xp = x if n_pad == N else jnp.pad(x, ((0, n_pad - N), (0, 0)))
    rows = n_pad // g
    xp = xp.reshape(rows, g * n_feat)

    # ---- packed-row tile size: big (amortize ~0.35us/step), sublane-aligned,
    #      capped so the grid has >= 2 parallel steps (v7x megacore). ----
    if rows < 8:
        tr = rows                                  # block == full dim (allowed)
    else:
        tr = min(max(8, _round_up(tile_m // g, 8)),
                 _round_up(pl.cdiv(rows, 2), 8))
    grid = (pl.cdiv(rows, tr),)                    # ragged last block is masked

    kernel = functools.partial(_appearance_decoder_kernel, approx_gelu=approx_gelu)

    def full_spec(arr):
        return pl.BlockSpec(arr.shape, lambda i: (0, 0))

    x_spec = pl.BlockSpec((tr, g * n_feat), lambda i: (i, 0))
    shs_spec = pl.BlockSpec((tr, g * n_shs), lambda i: (i, 0))
    op_spec = pl.BlockSpec((tr, g), lambda i: (i, 0))

    itemsize = jnp.dtype(compute_dtype).itemsize
    useful_macs = n_feat * H + H * H + H * n_shs + H
    w_elems = (g * n_feat) * (g * H) + (g * H) * (g * H) \
        + (g * H) * (g * n_shs) + (g * H) * g
    cost = pl.CostEstimate(
        flops=2 * n_pad * useful_macs,
        transcendentals=n_pad * (2 * H + 1),
        bytes_accessed=(n_pad * n_feat * 4                 # x read (f32)
                        + n_pad * (n_shs + 1) * 4          # outputs (f32)
                        + w_elems * itemsize               # packed weights
                        + g * (2 * H + n_shs + 1) * 4),    # packed biases
    )

    shs_p, op_p = pl.pallas_call(
        kernel,
        out_shape=(jax.ShapeDtypeStruct((rows, g * n_shs), f32),
                   jax.ShapeDtypeStruct((rows, g), f32)),
        grid_spec=pltpu.PrefetchScalarGridSpec(
            num_scalar_prefetch=0,
            grid=grid,
            in_specs=[
                x_spec,
                full_spec(w1), full_spec(b1),
                full_spec(w2), full_spec(b2),
                full_spec(wsh), full_spec(bsh),
                full_spec(wop), full_spec(bop),
            ],
            out_specs=(shs_spec, op_spec),
        ),
        compiler_params=pltpu.CompilerParams(
            # Row tiles are independent -> megacore / 2-TC sharding on v7x.
            dimension_semantics=("parallel",),
        ),
        cost_estimate=cost,
    )(xp, w1, b1, w2, b2, wsh, bsh, wop, bop)

    # Free row-major unpack; row slice only when a <g-row pad was added.
    shs = shs_p.reshape(n_pad, n_shs)
    opac = op_p.reshape(n_pad, 1)
    if n_pad != N:
        shs = shs[:N]
        opac = opac[:N]
    return {"shs": shs, "opacity": opac}


def init_params(key, n_features, hidden_dim=64):
    """Deterministic synthetic parameters (shapes match the PyTorch module)."""
    ks = jax.random.split(key, 8)

    def lin(kw, kb, fan_in, fan_out):
        lim = 1.0 / jnp.sqrt(fan_in)
        w = jax.random.uniform(kw, (fan_in, fan_out), jnp.float32, -lim, lim)
        b = jax.random.uniform(kb, (1, fan_out), jnp.float32, -lim, lim)
        return w, b

    w1, b1 = lin(ks[0], ks[1], n_features, hidden_dim)
    w2, b2 = lin(ks[2], ks[3], hidden_dim, hidden_dim)
    wsh, bsh = lin(ks[4], ks[5], hidden_dim, 16 * 3)
    wop, bop = lin(ks[6], ks[7], hidden_dim, 1)
    return {"w1": w1, "b1": b1, "w2": w2, "b2": b2,
            "wsh": wsh, "bsh": bsh, "wop": wop, "bop": bop}


def _reference_matched(x, p, *, compute_dtype, approx_gelu):
    """Pure-JAX reference mirroring the kernel's dtype/GELU strategy exactly."""
    cdt = compute_dtype
    f32 = jnp.float32
    h = jnp.dot(x.astype(cdt), p["w1"].astype(cdt), preferred_element_type=f32)
    h = jax.nn.gelu(h + p["b1"], approximate=approx_gelu)
    h = jnp.dot(h.astype(cdt), p["w2"].astype(cdt), preferred_element_type=f32)
    h = jax.nn.gelu(h + p["b2"], approximate=approx_gelu)
    hc = h.astype(cdt)
    shs = jnp.dot(hc, p["wsh"].astype(cdt), preferred_element_type=f32) + p["bsh"]
    op = jnp.dot(hc, p["wop"].astype(cdt), preferred_element_type=f32) + p["bop"]
    return {"shs": shs, "opacity": jax.nn.sigmoid(op)}


def _reference_fp32_erf(x, p):
    """Exact f32 / erf-GELU reference (torch.nn.GELU default semantics)."""
    h = jax.nn.gelu(x @ p["w1"] + p["b1"], approximate=False)
    h = jax.nn.gelu(h @ p["w2"] + p["b2"], approximate=False)
    return {"shs": h @ p["wsh"] + p["bsh"],
            "opacity": jax.nn.sigmoid(h @ p["wop"] + p["bop"])}


if __name__ == "__main__":
    key = jax.random.PRNGKey(0)
    k_x, k_p = jax.random.split(key)

    n_features = 32
    hidden_dim = 64
    params = init_params(k_p, n_features, hidden_dim)

    # Small shapes; 200 exercises the no-pad path, 77 the pad + ragged paths.
    for N in (200, 77):
        x = jax.random.normal(jax.random.fold_in(k_x, N), (N, n_features), jnp.float32)

        out = appearance_decoder(x, params)     # bf16 matmuls, tanh-GELU, packed rows
        out = jax.block_until_ready(out)

        assert out["shs"].shape == (N, 48)
        assert out["opacity"].shape == (N, 1)

        # 1) Tight check against a reference with identical dtype/GELU choices.
        ref_m = _reference_matched(x, params,
                                   compute_dtype=jnp.bfloat16, approx_gelu=True)
        assert jnp.allclose(out["shs"], ref_m["shs"], atol=2e-4, rtol=2e-4)
        assert jnp.allclose(out["opacity"], ref_m["opacity"], atol=2e-4, rtol=2e-4)

        # 2) Loose fidelity check against exact f32 / erf-GELU module semantics
        #    (bf16 matmul inputs + tanh GELU deviate at most at the ~1e-2 level).
        ref_f = _reference_fp32_erf(x, params)
        assert jnp.allclose(out["shs"], ref_f["shs"], atol=5e-2, rtol=5e-2)
        assert jnp.allclose(out["opacity"], ref_f["opacity"], atol=5e-2, rtol=5e-2)

    print("KERNEL_OK")
</pallas_src>

<mosaic_0001>
module attributes {stable_mosaic.version = 11 : i64} {
  func.func @_appearance_decoder_kernel(%arg0: i32, %arg1: memref<32x128xf32, #tpu.memory_space<vmem>>, %arg2: memref<128x256xbf16, #tpu.memory_space<vmem>>, %arg3: memref<1x256xf32, #tpu.memory_space<vmem>>, %arg4: memref<256x256xbf16, #tpu.memory_space<vmem>>, %arg5: memref<1x256xf32, #tpu.memory_space<vmem>>, %arg6: memref<256x192xbf16, #tpu.memory_space<vmem>>, %arg7: memref<1x192xf32, #tpu.memory_space<vmem>>, %arg8: memref<256x4xbf16, #tpu.memory_space<vmem>>, %arg9: memref<1x4xf32, #tpu.memory_space<vmem>>, %arg10: memref<32x192xf32, #tpu.memory_space<vmem>>, %arg11: memref<32x4xf32, #tpu.memory_space<vmem>>) attributes {dimension_semantics = [#tpu.dimension_semantics<parallel>], iteration_bounds = array<i64: 2>, scalar_prefetch = 0 : i64, scratch_operands = 0 : i64, tpu.core_type = #tpu.core_type<tc>, window_params = [{transform_indices = @transform_0, window_bounds = array<i64: 32, 128>}, {pipeline_mode = #tpu.pipeline_mode<synchronous>, transform_indices = @transform_1, window_bounds = array<i64: 128, 256>}, {pipeline_mode = #tpu.pipeline_mode<synchronous>, transform_indices = @transform_2, window_bounds = array<i64: 1, 256>}, {pipeline_mode = #tpu.pipeline_mode<synchronous>, transform_indices = @transform_3, window_bounds = array<i64: 256, 256>}, {pipeline_mode = #tpu.pipeline_mode<synchronous>, transform_indices = @transform_4, window_bounds = array<i64: 1, 256>}, {pipeline_mode = #tpu.pipeline_mode<synchronous>, transform_indices = @transform_5, window_bounds = array<i64: 256, 192>}, {pipeline_mode = #tpu.pipeline_mode<synchronous>, transform_indices = @transform_6, window_bounds = array<i64: 1, 192>}, {pipeline_mode = #tpu.pipeline_mode<synchronous>, transform_indices = @transform_7, window_bounds = array<i64: 256, 4>}, {pipeline_mode = #tpu.pipeline_mode<synchronous>, transform_indices = @transform_8, window_bounds = array<i64: 1, 4>}, {transform_indices = @transform_9, window_bounds = array<i64: 32, 192>}, {transform_indices = @transform_10, window_bounds = array<i64: 32, 4>}]} {
    %c0 = arith.constant 0 : index
    %c0_0 = arith.constant 0 : index
    %0 = vector.load %arg1[%c0, %c0_0] : memref<32x128xf32, #tpu.memory_space<vmem>>, vector<32x128xf32>
    %1 = arith.truncf %0 : vector<32x128xf32> to vector<32x128xbf16>
    %c0_1 = arith.constant 0 : index
    %c0_2 = arith.constant 0 : index
    %2 = vector.load %arg2[%c0_1, %c0_2] : memref<128x256xbf16, #tpu.memory_space<vmem>>, vector<128x256xbf16>
    %cst = arith.constant dense<0.000000e+00> : vector<32x256xf32>
    %3 = tpu.matmul %1, %2, %cst {dimension_numbers = #tpu.dot_dimension_numbers<[1], [0], [0], [1], [0, 0, 1, 1], [], []>} : vector<32x128xbf16>, vector<128x256xbf16>, vector<32x256xf32> -> vector<32x256xf32>
    %c0_3 = arith.constant 0 : index
    %c0_4 = arith.constant 0 : index
    %4 = vector.load %arg3[%c0_3, %c0_4] : memref<1x256xf32, #tpu.memory_space<vmem>>, vector<1x256xf32>
    %5 = vector.broadcast %4 : vector<1x256xf32> to vector<32x256xf32>
    %6 = arith.addf %3, %5 : vector<32x256xf32>
    %7 = arith.mulf %6, %6 : vector<32x256xf32>
    %8 = arith.mulf %6, %7 : vector<32x256xf32>
    %cst_5 = arith.constant 4.471500e-02 : f32
    %9 = vector.broadcast %cst_5 : f32 to vector<32x256xf32>
    %10 = arith.mulf %9, %8 : vector<32x256xf32>
    %11 = arith.addf %6, %10 : vector<32x256xf32>
    %cst_6 = arith.constant 0.797884583 : f32
    %12 = vector.broadcast %cst_6 : f32 to vector<32x256xf32>
    %13 = arith.mulf %12, %11 : vector<32x256xf32>
    %14 = math.tanh %13 : vector<32x256xf32>
    %cst_7 = arith.constant 1.000000e+00 : f32
    %15 = vector.broadcast %cst_7 : f32 to vector<32x256xf32>
    %16 = arith.addf %15, %14 : vector<32x256xf32>
    %cst_8 = arith.constant 5.000000e-01 : f32
    %17 = vector.broadcast %cst_8 : f32 to vector<32x256xf32>
    %18 = arith.mulf %17, %16 : vector<32x256xf32>
    %19 = arith.mulf %6, %18 : vector<32x256xf32>
    %20 = arith.truncf %19 : vector<32x256xf32> to vector<32x256xbf16>
    %c0_9 = arith.constant 0 : index
    %c0_10 = arith.constant 0 : index
    %21 = vector.load %arg4[%c0_9, %c0_10] : memref<256x256xbf16, #tpu.memory_space<vmem>>, vector<256x256xbf16>
    %cst_11 = arith.constant dense<0.000000e+00> : vector<32x256xf32>
    %22 = tpu.matmul %20, %21, %cst_11 {dimension_numbers = #tpu.dot_dimension_numbers<[1], [0], [0], [1], [0, 0, 1, 1], [], []>} : vector<32x256xbf16>, vector<256x256xbf16>, vector<32x256xf32> -> vector<32x256xf32>
    %c0_12 = arith.constant 0 : index
    %c0_13 = arith.constant 0 : index
    %23 = vector.load %arg5[%c0_12, %c0_13] : memref<1x256xf32, #tpu.memory_space<vmem>>, vector<1x256xf32>
    %24 = vector.broadcast %23 : vector<1x256xf32> to vector<32x256xf32>
    %25 = arith.addf %22, %24 : vector<32x256xf32>
    %26 = arith.mulf %25, %25 : vector<32x256xf32>
    %27 = arith.mulf %25, %26 : vector<32x256xf32>
    %cst_14 = arith.constant 4.471500e-02 : f32
    %28 = vector.broadcast %cst_14 : f32 to vector<32x256xf32>
    %29 = arith.mulf %28, %27 : vector<32x256xf32>
    %30 = arith.addf %25, %29 : vector<32x256xf32>
    %cst_15 = arith.constant 0.797884583 : f32
    %31 = vector.broadcast %cst_15 : f32 to vector<32x256xf32>
    %32 = arith.mulf %31, %30 : vector<32x256xf32>
    %33 = math.tanh %32 : vector<32x256xf32>
    %cst_16 = arith.constant 1.000000e+00 : f32
    %34 = vector.broadcast %cst_16 : f32 to vector<32x256xf32>
    %35 = arith.addf %34, %33 : vector<32x256xf32>
    %cst_17 = arith.constant 5.000000e-01 : f32
    %36 = vector.broadcast %cst_17 : f32 to vector<32x256xf32>
    %37 = arith.mulf %36, %35 : vector<32x256xf32>
    %38 = arith.mulf %25, %37 : vector<32x256xf32>
    %39 = arith.truncf %38 : vector<32x256xf32> to vector<32x256xbf16>
    %c0_18 = arith.constant 0 : index
    %c0_19 = arith.constant 0 : index
    %40 = vector.load %arg6[%c0_18, %c0_19] : memref<256x192xbf16, #tpu.memory_space<vmem>>, vector<256x192xbf16>
    %cst_20 = arith.constant dense<0.000000e+00> : vector<32x192xf32>
    %41 = tpu.matmul %39, %40, %cst_20 {dimension_numbers = #tpu.dot_dimension_numbers<[1], [0], [0], [1], [0, 0, 1, 1], [], []>} : vector<32x256xbf16>, vector<256x192xbf16>, vector<32x192xf32> -> vector<32x192xf32>
    %c0_21 = arith.constant 0 : index
    %c0_22 = arith.constant 0 : index
    %42 = vector.load %arg7[%c0_21, %c0_22] : memref<1x192xf32, #tpu.memory_space<vmem>>, vector<1x192xf32>
    %43 = vector.broadcast %42 : vector<1x192xf32> to vector<32x192xf32>
    %44 = arith.addf %41, %43 : vector<32x192xf32>
    %c0_23 = arith.constant 0 : index
    %c0_24 = arith.constant 0 : index
    %45 = vector.load %arg10[%c0_23, %c0_24] : memref<32x192xf32, #tpu.memory_space<vmem>>, vector<32x192xf32>
    tpu.vector_store %arg10[%c0_23, %c0_24], %44 {strides = array<i32>} : memref<32x192xf32, #tpu.memory_space<vmem>>, vector<32x192xf32>,
    %c0_25 = arith.constant 0 : index
    %c0_26 = arith.constant 0 : index
    %46 = vector.load %arg8[%c0_25, %c0_26] : memref<256x4xbf16, #tpu.memory_space<vmem>>, vector<256x4xbf16>
    %cst_27 = arith.constant dense<0.000000e+00> : vector<32x4xf32>
    %47 = tpu.matmul %39, %46, %cst_27 {dimension_numbers = #tpu.dot_dimension_numbers<[1], [0], [0], [1], [0, 0, 1, 1], [], []>} : vector<32x256xbf16>, vector<256x4xbf16>, vector<32x4xf32> -> vector<32x4xf32>
    %c0_28 = arith.constant 0 : index
    %c0_29 = arith.constant 0 : index
    %48 = vector.load %arg9[%c0_28, %c0_29] : memref<1x4xf32, #tpu.memory_space<vmem>>, vector<1x4xf32>
    %49 = vector.broadcast %48 : vector<1x4xf32> to vector<32x4xf32>
    %50 = arith.addf %47, %49 : vector<32x4xf32>
    %51 = arith.negf %50 : vector<32x4xf32>
    %52 = math.exp %51 : vector<32x4xf32>
    %cst_30 = arith.constant 1.000000e+00 : f32
    %53 = vector.broadcast %cst_30 : f32 to vector<32x4xf32>
    %54 = arith.addf %53, %52 : vector<32x4xf32>
    %55 = arith.divf %53, %54 : vector<32x4xf32>
    %c0_31 = arith.constant 0 : index
    %c0_32 = arith.constant 0 : index
    %56 = vector.load %arg11[%c0_31, %c0_32] : memref<32x4xf32, #tpu.memory_space<vmem>>, vector<32x4xf32>
    tpu.vector_store %arg11[%c0_31, %c0_32], %55 {strides = array<i32>} : memref<32x4xf32, #tpu.memory_space<vmem>>, vector<32x4xf32>,
    return
  }
  func.func @transform_0(%arg0: i32) -> (i32, i32) {
    %c0_i32 = arith.constant 0 : i32
    %c0_i32_0 = arith.constant 0 : i32
    return %arg0, %c0_i32 : i32, i32
  }
  func.func @transform_1(%arg0: i32) -> (i32, i32) {
    %c0_i32 = arith.constant 0 : i32
    %c0_i32_0 = arith.constant 0 : i32
    %c0_i32_1 = arith.constant 0 : i32
    return %c0_i32, %c0_i32_0 : i32, i32
  }
  func.func @transform_2(%arg0: i32) -> (i32, i32) {
    %c0_i32 = arith.constant 0 : i32
    %c0_i32_0 = arith.constant 0 : i32
    %c0_i32_1 = arith.constant 0 : i32
    return %c0_i32, %c0_i32_0 : i32, i32
  }
  func.func @transform_3(%arg0: i32) -> (i32, i32) {
    %c0_i32 = arith.constant 0 : i32
    %c0_i32_0 = arith.constant 0 : i32
    %c0_i32_1 = arith.constant 0 : i32
    return %c0_i32, %c0_i32_0 : i32, i32
  }
  func.func @transform_4(%arg0: i32) -> (i32, i32) {
    %c0_i32 = arith.constant 0 : i32
    %c0_i32_0 = arith.constant 0 : i32
    %c0_i32_1 = arith.constant 0 : i32
    return %c0_i32, %c0_i32_0 : i32, i32
  }
  func.func @transform_5(%arg0: i32) -> (i32, i32) {
    %c0_i32 = arith.constant 0 : i32
    %c0_i32_0 = arith.constant 0 : i32
    %c0_i32_1 = arith.constant 0 : i32
    return %c0_i32, %c0_i32_0 : i32, i32
  }
  func.func @transform_6(%arg0: i32) -> (i32, i32) {
    %c0_i32 = arith.constant 0 : i32
    %c0_i32_0 = arith.constant 0 : i32
    %c0_i32_1 = arith.constant 0 : i32
    return %c0_i32, %c0_i32_0 : i32, i32
  }
  func.func @transform_7(%arg0: i32) -> (i32, i32) {
    %c0_i32 = arith.constant 0 : i32
    %c0_i32_0 = arith.constant 0 : i32
    %c0_i32_1 = arith.constant 0 : i32
    return %c0_i32, %c0_i32_0 : i32, i32
  }
  func.func @transform_8(%arg0: i32) -> (i32, i32) {
    %c0_i32 = arith.constant 0 : i32
    %c0_i32_0 = arith.constant 0 : i32
    %c0_i32_1 = arith.constant 0 : i32
    return %c0_i32, %c0_i32_0 : i32, i32
  }
  func.func @transform_9(%arg0: i32) -> (i32, i32) {
    %c0_i32 = arith.constant 0 : i32
    %c0_i32_0 = arith.constant 0 : i32
    return %arg0, %c0_i32 : i32, i32
  }
  func.func @transform_10(%arg0: i32) -> (i32, i32) {
    %c0_i32 = arith.constant 0 : i32
    %c0_i32_0 = arith.constant 0 : i32
    return %arg0, %c0_i32 : i32, i32
  }
}

</mosaic_0001>

<bundles_post_ra>
// kernel: tpu_custom_call.1
= control target key start
LH: loop header
LB: loop body
LE: loop exit
PB: predicated region body
PF: predicated region fallthrough
CT: control target
= control target key end

     0   :  { %s3504_s0 = inlined_call_operand.vmem [shape: f32[50,128], index: 0, kind: input, shape index: {}]   ;;  %s3505_s1 = inlined_call_operand.vmem [shape: bf16[128,256], index: 1, kind: input, shape index: {}]   ;;  %s3506_s2 = inlined_call_operand.vmem [shape: f32[1,256], index: 2, kind: input, shape index: {}]   ;;  %s3507_s3 = inlined_call_operand.vmem [shape: bf16[256,256], index: 3, kind: input, shape index: {}]   ;;  %s3508_s4 = inlined_call_operand.vmem [shape: f32[1,256], index: 4, kind: input, shape index: {}]   ;;  %s3509_s5 = inlined_call_operand.vmem [shape: bf16[256,192], index: 5, kind: input, shape index: {}]   ;;  %s3510_s6 = inlined_call_operand.vmem [shape: f32[1,192], index: 6, kind: input, shape index: {}]   ;;  %s3511_s7 = inlined_call_operand.vmem [shape: bf16[256,4], index: 7, kind: input, shape index: {}]   ;;  %s3512_s8 = inlined_call_operand.vmem [shape: f32[1,4], index: 8, kind: input, shape index: {}]   ;;  %s3513_s9 = inlined_call_operand.hbm [shape: f32[50,192], index: 9, kind: output, shape index: {0}]   ;;  %s3514_s10 = inlined_call_operand.vmem [shape: f32[50,4], index: 10, kind: output, shape index: {1}]  }
   0x1   :  { %3518 = sst [smem:[#allocation8_spill]] %s3504_s0 }
   0x2   :  { %3519 = sst [smem:[#allocation9_spill]] %s3505_s1 }
   0x3   :  { %3520 = sst [smem:[#allocation10_spill]] %s3506_s2 }
   0x4   :  { %3521 = sst [smem:[#allocation11_spill]] %s3507_s3 }
   0x5   :  { %3522 = sst [smem:[#allocation12_spill]] %s3508_s4 }
   0x6   :  { %16 = vsyncpa [#allocation3], 0 }
   0x7   :  { %18 = vsyncpa [#allocation3 + $0x1], 0  ;;  %s2670_s13 = smov 0   ;;  %s2672_s14 = smov 0  }
   0x8   :  { %s2674_s15 = smov 0   ;;  %s2676_s16 = smov 0  }
   0x9 LB: > { %3523 = sst [smem:[#allocation6_spill]] %s2574_s15  ;;  %s2691_s17 = sadd.s32 4294967295, %s2578_s16   ;;  %s2578_s16 = sphi %s2676_s16, %s3542_s16   ;;  %s2574_s15 = sphi %s2674_s15, %s3539_s15   ;;  %s2570_s14 = sphi %s2672_s14, %s3541_s14   ;;  %s2566_s13 = sphi %s2670_s13, %s3540_s13  }
   0xa   : > { %s1796_s18 = sadd.s32 4294967294, %s2578_s16   ;;  %s2695_s19 = sadd.s32 1, %s2578_s16  }
   0xb   : > { %s225_s20 = sadd.s32 1, %s2574_s15  ;;  %s222_s21 = ssub.s32 %s2578_s16, %s2695_s19 }
   0xc   : > { %p235_p0 = scmp.ne.s32.totalorder %s2574_s15, %s2570_s14  ;;  %p223_p1 = scmp.eq.s32.totalorder %s222_s21, 0 }
   0xd   : > { %p236_p2 = scmp.eq.s32.totalorder %s2691_s17, 1  ;;  %p241_p3 = scmp.ne.s32.totalorder %s2570_s14, %s2566_s13 }
   0xe   : > { %p242_p4 = scmp.eq.s32.totalorder %s1796_s18, 1  ;;  %p1799_p7 = scmp.ge.s32.totalorder %s2578_s16, 1 }
   0xf   : > { %s2706_s22 = scalar_select %p223_p1, %s2574_s15, %s225_s20  }
  0x10   : > { %p2708_p5 = por %p236_p2, %p235_p0  ;;  %p2712_p6 = por %p242_p4, %p241_p3 }
  0x11   : > { %3524 = sst [smem:[#allocation7_spill]] %s2706_s22  ;;  %p327_p8 = scmp.lt.s32.totalorder %s2578_s16, 3 }
  0x13   : > { %p328_p9 = pnand %p1799_p7, %p327_p8 }
  0x14   : > { %s3527_s1 = sld [smem:[#allocation9_spill]] (!%p328_p9)  ;;  %s2767_s21 = sshll.u32 (!%p328_p9), %s2691_s17, 2 }
  0x15   : > { %331 = sbr.rel (%p328_p9) target bundleno = 687 (0x2af), region = 56  ;;  %p378_p10 = scmp.lt.s32.totalorder (!%p328_p9), %s2767_s21, 6 }
  0x16   : > { %s3528_s0 = sld [smem:[#allocation8_spill]] (!%p328_p9)  ;;  %s3359_s18 = sand.u32 (!%p328_p9), 1, %s2570_s14  }
  0x17   : > { %s3529_s3 = sld [smem:[#allocation11_spill]] (!%p328_p9)  ;;  %s1800_s26 = sshll.u32 (!%p328_p9), %s3359_s18, 6 }
  0x18   : > { %s3530_s2 = sld [smem:[#allocation10_spill]] (!%p328_p9)  ;;  %s1801_s29 = sshll.u32 (!%p328_p9), %s3359_s18, 5 }
  0x19   : > { %s3531_s4 = sld [smem:[#allocation12_spill]] (!%p328_p9)  ;;  %s3386_s15 = scalar_lea.vmem (!%p328_p9), [#allocation4], %s1801_s29  }
  0x1a   : > { %v1862_v0 = vld [vmem:[%s3527_s1 + $0x70] sm:$0xf]  ;;  %v2233_v1 = vld [vmem:[%s3527_s1 + $0x74] sm:$0xf0]  ;;  %v2232_v2 = vld [vmem:[%s3527_s1 + $0x74] sm:$0xf] }
  0x1b   : > { %v1863_v3 = vor.u32 %v2233_v1, %v1862_v0  ;;  %v1864_v4 = vld [vmem:[%s3527_s1 + $0x78] sm:$0xf0]  ;;  %v1854_v5 = vld [vmem:[%s3527_s1 + $0x60] sm:$0xf]  ;;  %v2231_v6 = vld [vmem:[%s3527_s1 + $0x64] sm:$0xf0] }
  0x1c   : > { %v1867_v7 = vor.u32 %v2232_v2, %v1864_v4  ;;  %v2230_v8 = vld [vmem:[%s3527_s1 + $0x64] sm:$0xf]  ;;  %v1856_v9 = vld [vmem:[%s3527_s1 + $0x68] sm:$0xf0]  ;;  %v1855_v10 = vor.u32 %v2231_v6, %v1854_v5  ;;  %v1846_v12 = vld [vmem:[%s3527_s1 + $0x50] sm:$0xf] }
  0x1d   : > { %506 = vmatpush.bf16.msra.mxu0 %v1863_v3  ;;  %v1859_v11 = vor.u32 %v2230_v8, %v1856_v9  ;;  %v2229_v13 = vld [vmem:[%s3527_s1 + $0x54] sm:$0xf0]  ;;  %v2228_v14 = vld [vmem:[%s3527_s1 + $0x54] sm:$0xf]  ;;  %v1848_v15 = vld [vmem:[%s3527_s1 + $0x58] sm:$0xf0] }
  0x1e   : > { %525 = vmatpush.bf16.msra.mxu1 %v1867_v7  ;;  %v1847_v16 = vor.u32 %v2229_v13, %v1846_v12  ;;  %v1851_v17 = vor.u32 %v2228_v14, %v1848_v15  ;;  %v1838_v18 = vld [vmem:[%s3527_s1 + $0x40] sm:$0xf]  ;;  %v2227_v19 = vld [vmem:[%s3527_s1 + $0x44] sm:$0xf0]  ;;  %v2226_v20 = vld [vmem:[%s3527_s1 + $0x44] sm:$0xf] }
  0x1f   : > { %v1840_v21 = vld [vmem:[%s3527_s1 + $0x48] sm:$0xf0]  ;;  %v1839_v22 = vor.u32 %v2227_v19, %v1838_v18  ;;  %v1830_v24 = vld [vmem:[%s3527_s1 + $0x30] sm:$0xf]  ;;  %v2225_v25 = vld [vmem:[%s3527_s1 + $0x34] sm:$0xf0] }
  0x20   : > { %v1843_v23 = vor.u32 %v2226_v20, %v1840_v21  ;;  %v2224_v26 = vld [vmem:[%s3527_s1 + $0x34] sm:$0xf]  ;;  %v1832_v27 = vld [vmem:[%s3527_s1 + $0x38] sm:$0xf0]  ;;  %v1831_v28 = vor.u32 %v2225_v25, %v1830_v24  ;;  %v1822_v30 = vld [vmem:[%s3527_s1 + $0x20] sm:$0xf] }
  0x21   : > { %507 = vmatpush.bf16.msra.mxu0 %v1855_v10  ;;  %v1835_v29 = vor.u32 %v2224_v26, %v1832_v27  ;;  %v2223_v31 = vld [vmem:[%s3527_s1 + $0x24] sm:$0xf0]  ;;  %v2222_v32 = vld [vmem:[%s3527_s1 + $0x24] sm:$0xf]  ;;  %v1824_v33 = vld [vmem:[%s3527_s1 + $0x28] sm:$0xf0] }
  0x22   : > { %526 = vmatpush.bf16.msra.mxu1 %v1859_v11  ;;  %s379_s11 = scalar_select %p378_p10, %s2767_s21, 6  ;;  %v1823_v34 = vor.u32 %v2223_v31, %v1822_v30  ;;  %v1827_v35 = vor.u32 %v2222_v32, %v1824_v33  ;;  %v1814_v36 = vld [vmem:[%s3527_s1 + $0x10] sm:$0xf]  ;;  %v2221_v37 = vld [vmem:[%s3527_s1 + $0x14] sm:$0xf0]  ;;  %vm1245_vm0 = vcmask 523264  }
  0x23   : > { %v2220_v38 = vld [vmem:[%s3527_s1 + $0x14] sm:$0xf]  ;;  %v1816_v39 = vld [vmem:[%s3527_s1 + $0x18] sm:$0xf0]  ;;  %v1815_v40 = vor.u32 %v2221_v37, %v1814_v36  ;;  %v1806_v42 = vld [vmem:[%s3527_s1] sm:$0xf] }
  0x24   : > { %s1803_s30 = sshll.u32 %s379_s11, 3  ;;  %v1819_v41 = vor.u32 %v2220_v38, %v1816_v39  ;;  %v2219_v43 = vld [vmem:[%s3527_s1 + $0x4] sm:$0xf0]  ;;  %v2218_v44 = vld [vmem:[%s3527_s1 + $0x4] sm:$0xf]  ;;  %vm1499_vm4 = vcmask 31744  }
  0x25   : > { %508 = vmatpush.bf16.msra.mxu0 %v1847_v16  ;;  %s381_s27 = scalar_lea.vmem %s3528_s0, %s1803_s30  ;;  %v1808_v45 = vld [vmem:[%s3527_s1 + $0x8] sm:$0xf0]  ;;  %v1807_v46 = vor.u32 %v2219_v43, %v1806_v42  ;;  %v1926_v54 = vld [vmem:[%s3529_s3 + $0x70] sm:$0xf]  ;;  %v2249_v55 = vld [vmem:[%s3529_s3 + $0x74] sm:$0xf0] }
  0x26   : > { %527 = vmatpush.bf16.msra.mxu1 %v1851_v17  ;;  %v398_v47 = vld [vmem:[%s381_s27] sm:$0xff]  ;;  %v399_v48 = vld [vmem:[%s381_s27 + $0x8] sm:$0xff]  ;;  %v1811_v49 = vor.u32 %v2218_v44, %v1808_v45  ;;  %v400_v51 = vld [vmem:[%s381_s27 + $0x10] sm:$0xff]  ;;  %v1927_v57 = vor.u32 %v2249_v55, %v1926_v54  ;;  %s3516_s22 = scalar_lea.sflag [#allocation3], %s3359_s18  ;;  %s1517_s30 = ssub.s32 (%p2708_p5), 7, %s2767_s21 }
  0x27   : > { %v402_v50 = vpack.c.bf16 %v399_v48, %v398_v47  ;;  %v401_v52 = vld [vmem:[%s381_s27 + $0x18] sm:$0xff]  ;;  %v1990_v56 = vld [vmem:[%s3529_s3 + $0xf0] sm:$0xf]  ;;  %v2248_v59 = vld [vmem:[%s3529_s3 + $0x74] sm:$0xf]  ;;  %s3368_s27 = scalar_lea.vmem [#allocation2], %s1800_s26 }
  0x28   : > { %v403_v53 = vpack.c.bf16 %v401_v52, %v400_v51  ;;  %v2265_v58 = vld [vmem:[%s3529_s3 + $0xf4] sm:$0xf0]  ;;  %v1928_v60 = vld [vmem:[%s3529_s3 + $0x78] sm:$0xf0]  ;;  %v2264_v63 = vld [vmem:[%s3529_s3 + $0xf4] sm:$0xf]  ;;  %818 = vmatpush.bf16.msra.mxu2 %v1927_v57 }
  0x29   : > { %509 = vmatpush.bf16.msra.mxu0 %v1839_v22  ;;  %v1991_v61 = vor.u32 %v2265_v58, %v1990_v56  ;;  %v1931_v62 = vor.u32 %v2248_v59, %v1928_v60  ;;  %v1992_v0 = vld [vmem:[%s3529_s3 + $0xf8] sm:$0xf0]  ;;  %v1918_v2 = vld [vmem:[%s3529_s3 + $0x60] sm:$0xf]  ;;  %v2247_v3 = vld [vmem:[%s3529_s3 + $0x64] sm:$0xf0] }
  0x2a   : > { %528 = vmatpush.bf16.msra.mxu1 %v1843_v23  ;;  %v1995_v1 = vor.u32 %v2264_v63, %v1992_v0  ;;  %v1982_v4 = vld [vmem:[%s3529_s3 + $0xe0] sm:$0xf]  ;;  %v1919_v5 = vor.u32 %v2247_v3, %v1918_v2  ;;  %v2263_v6 = vld [vmem:[%s3529_s3 + $0xe4] sm:$0xf0]  ;;  %v2246_v7 = vld [vmem:[%s3529_s3 + $0x64] sm:$0xf] }
  0x2b   : > { %837 = vmatpush.bf16.msra.mxu3 %v1991_v61  ;;  %v1920_v8 = vld [vmem:[%s3529_s3 + $0x68] sm:$0xf0]  ;;  %v1983_v9 = vor.u32 %v2263_v6, %v1982_v4  ;;  %v2262_v11 = vld [vmem:[%s3529_s3 + $0xe4] sm:$0xf]  ;;  %v1910_v14 = vld [vmem:[%s3529_s3 + $0x50] sm:$0xf] }
  0x2c   : > { %v1923_v10 = vor.u32 %v2246_v7, %v1920_v8  ;;  %v1984_v12 = vld [vmem:[%s3529_s3 + $0xe8] sm:$0xf0]  ;;  %819 = vmatpush.bf16.msra.mxu2 %v1919_v5  ;;  %v2245_v15 = vld [vmem:[%s3529_s3 + $0x54] sm:$0xf0]  ;;  %v1974_v16 = vld [vmem:[%s3529_s3 + $0xd0] sm:$0xf] }
  0x2d   : > { %510 = vmatpush.bf16.msra.mxu0 %v1831_v28  ;;  %v1987_v13 = vor.u32 %v2262_v11, %v1984_v12  ;;  %v1911_v17 = vor.u32 %v2245_v15, %v1910_v14  ;;  %v2261_v18 = vld [vmem:[%s3529_s3 + $0xd4] sm:$0xf0]  ;;  %v2244_v19 = vld [vmem:[%s3529_s3 + $0x54] sm:$0xf]  ;;  %v1912_v20 = vld [vmem:[%s3529_s3 + $0x58] sm:$0xf0] }
  0x2e   : > { %529 = vmatpush.bf16.msra.mxu1 %v1835_v29  ;;  %v1975_v21 = vor.u32 %v2261_v18, %v1974_v16  ;;  %v1915_v22 = vor.u32 %v2244_v19, %v1912_v20  ;;  %v2260_v23 = vld [vmem:[%s3529_s3 + $0xd4] sm:$0xf]  ;;  %v1976_v24 = vld [vmem:[%s3529_s3 + $0xd8] sm:$0xf0]  ;;  %v1902_v26 = vld [vmem:[%s3529_s3 + $0x40] sm:$0xf] }
  0x2f   : > { %838 = vmatpush.bf16.msra.mxu3 %v1983_v9  ;;  %v1979_v25 = vor.u32 %v2260_v23, %v1976_v24  ;;  %v2243_v27 = vld [vmem:[%s3529_s3 + $0x44] sm:$0xf0]  ;;  %v1966_v28 = vld [vmem:[%s3529_s3 + $0xc0] sm:$0xf]  ;;  %v2242_v31 = vld [vmem:[%s3529_s3 + $0x44] sm:$0xf] }
  0x30   : > { %820 = vmatpush.bf16.msra.mxu2 %v1911_v17  ;;  %v1903_v29 = vor.u32 %v2243_v27, %v1902_v26  ;;  %v2259_v30 = vld [vmem:[%s3529_s3 + $0xc4] sm:$0xf0]  ;;  %v1904_v32 = vld [vmem:[%s3529_s3 + $0x48] sm:$0xf0]  ;;  %v1894_v38 = vld [vmem:[%s3529_s3 + $0x30] sm:$0xf] }
  0x31   : > { %511 = vmatpush.bf16.msra.mxu0 %v1823_v34  ;;  %v1967_v33 = vor.u32 %v2259_v30, %v1966_v28  ;;  %v1907_v34 = vor.u32 %v2242_v31, %v1904_v32  ;;  %v1968_v36 = vld [vmem:[%s3529_s3 + $0xc8] sm:$0xf0]  ;;  %v2241_v39 = vld [vmem:[%s3529_s3 + $0x34] sm:$0xf0]  ;;  %v2240_v43 = vld [vmem:[%s3529_s3 + $0x34] sm:$0xf] }
  0x32   : > { %530 = vmatpush.bf16.msra.mxu1 %v1827_v35  ;;  %v2258_v35 = vld [vmem:[%s3529_s3 + $0xc4] sm:$0xf]  ;;  %v2257_v42 = vld [vmem:[%s3529_s3 + $0xb4] sm:$0xf0]  ;;  %v1896_v44 = vld [vmem:[%s3529_s3 + $0x38] sm:$0xf0] }
  0x33   : > { %839 = vmatpush.bf16.msra.mxu3 %v1975_v21  ;;  %v1971_v37 = vor.u32 %v2258_v35, %v1968_v36  ;;  %v2256_v47 = vld [vmem:[%s3529_s3 + $0xb4] sm:$0xf]  ;;  %v1960_v48 = vld [vmem:[%s3529_s3 + $0xb8] sm:$0xf0]  ;;  %v2239_v51 = vld [vmem:[%s3529_s3 + $0x24] sm:$0xf0] }
  0x34   : > { %821 = vmatpush.bf16.msra.mxu2 %v1903_v29  ;;  %v1950_v52 = vld [vmem:[%s3529_s3 + $0xa0] sm:$0xf]  ;;  %v2255_v54 = vld [vmem:[%s3529_s3 + $0xa4] sm:$0xf0]  ;;  %v2238_v55 = vld [vmem:[%s3529_s3 + $0x24] sm:$0xf] }
  0x35   : > { %512 = vmatpush.bf16.msra.mxu0 %v1815_v40  ;;  %v1958_v40 = vld [vmem:[%s3529_s3 + $0xb0] sm:$0xf]  ;;  %v1888_v56 = vld [vmem:[%s3529_s3 + $0x28] sm:$0xf0]  ;;  %v1951_v57 = vor.u32 %v2255_v54, %v1950_v52  ;;  %v2254_v59 = vld [vmem:[%s3529_s3 + $0xa4] sm:$0xf] }
  0x36   : > { %531 = vmatpush.bf16.msra.mxu1 %v1819_v41  ;;  %v1895_v41 = vor.u32 %v2241_v39, %v1894_v38  ;;  %v1959_v45 = vor.u32 %v2257_v42, %v1958_v40  ;;  %v1891_v58 = vor.u32 %v2238_v55, %v1888_v56  ;;  %v1952_v60 = vld [vmem:[%s3529_s3 + $0xa8] sm:$0xf0]  ;;  %v420_v61 = vld [vmem:[%s3530_s2] sm:$0x3]  ;;  %v1878_v63 = vld [vmem:[%s3529_s3 + $0x10] sm:$0xf] }
  0x37   : > { %840 = vmatpush.bf16.msra.mxu3 %v1967_v33  ;;  %v2237_v0 = vld [vmem:[%s3529_s3 + $0x14] sm:$0xf0]  ;;  %v2236_v4 = vld [vmem:[%s3529_s3 + $0x14] sm:$0xf]  ;;  %v1880_v5 = vld [vmem:[%s3529_s3 + $0x18] sm:$0xf0] }
  0x38   : > { %822 = vmatpush.bf16.msra.mxu2 %v1895_v41  ;;  %v1879_v2 = vor.u32 %v2237_v0, %v1878_v63  ;;  %v2253_v3 = vld [vmem:[%s3529_s3 + $0x94] sm:$0xf0]  ;;  %v2987_v6 = vperm.slane %v420_v61, 0  ;;  %v1883_v8 = vor.u32 %v2236_v4, %v1880_v5  ;;  %v2252_v9 = vld [vmem:[%s3529_s3 + $0x94] sm:$0xf]  ;;  %v2995_v11 = vperm.slane %v420_v61, 1 }
  0x39   : > { %513 = vmatpush.bf16.msra.mxu0 %v1807_v46  ;;  %v1899_v46 = vor.u32 %v2240_v43, %v1896_v44  ;;  %v2235_v14 = vld [vmem:[%s3529_s3 + $0x4] sm:$0xf0]  ;;  %v1934_v15 = vld [vmem:[%s3529_s3 + $0x80] sm:$0xf]  ;;  %v2234_v19 = vld [vmem:[%s3529_s3 + $0x4] sm:$0xf] }
  0x3a   : > { %532 = vmatpush.bf16.msra.mxu1 %v1811_v49  ;;  %v1963_v49 = vor.u32 %v2256_v47, %v1960_v48  ;;  %v2251_v18 = vld [vmem:[%s3529_s3 + $0x84] sm:$0xf0]  ;;  %v1872_v20 = vld [vmem:[%s3529_s3 + $0x8] sm:$0xf0]  ;;  %p1518_p11 = scmp.lt.s32.totalorder (%p2708_p5), %s1517_s30, 4 }
  0x3b   : > { %841 = vmatpush.bf16.msra.mxu3 %v1959_v45  ;;  %v1935_v23 = vor.u32 %v2251_v18, %v1934_v15  ;;  %v1875_v24 = vor.u32 %v2234_v19, %v1872_v20  ;;  %v1936_v26 = vld [vmem:[%s3529_s3 + $0x88] sm:$0xf0] }
  0x3c   : > { %514 = vmatmul.bf16.vlgmr.msra.gmra.mxu0 %v402_v50 }
  0x3d   : > { %533 = vmatmul.bf16.vlgmr.msra.gmra.mxu1 %v402_v50  ;;  %856 = vmatpush.bf16.msrb.mxu0 %v1931_v62  ;;  %v1886_v50 = vld [vmem:[%s3529_s3 + $0x20] sm:$0xf]  ;;  %v1955_v62 = vor.u32 %v2254_v59, %v1952_v60 }
  0x3e   : > { %875 = vmatpush.bf16.msrb.mxu1 %v1995_v1  ;;  %v1942_v1 = vld [vmem:[%s3529_s3 + $0x90] sm:$0xf] }
  0x3f   : > { %842 = vmatpush.bf16.msra.mxu3 %v1951_v57  ;;  %v1943_v7 = vor.u32 %v2253_v3, %v1942_v1 }
  0x41   : > { %857 = vmatpush.bf16.msrb.mxu0 %v1923_v10  ;;  %v1944_v10 = vld [vmem:[%s3529_s3 + $0x98] sm:$0xf0] }
  0x42   : > { %876 = vmatpush.bf16.msrb.mxu1 %v1987_v13  ;;  %v1947_v12 = vor.u32 %v2252_v9, %v1944_v10  ;;  %v1870_v13 = vld [vmem:[%s3529_s3] sm:$0xf] }
  0x43   : > { %843 = vmatpush.bf16.msra.mxu3 %v1943_v7  ;;  %v1871_v17 = vor.u32 %v2235_v14, %v1870_v13 }
  0x45   : > { %858 = vmatpush.bf16.msrb.mxu0 %v1915_v22 }
  0x46   : > { %877 = vmatpush.bf16.msrb.mxu1 %v1979_v25  ;;  %v2250_v25 = vld [vmem:[%s3529_s3 + $0x84] sm:$0xf] }
  0x47   : > { %v1939_v28 = vor.u32 %v2250_v25, %v1936_v26  ;;  %844 = vmatpush.bf16.msra.mxu3 %v1935_v23 }
  0x49   : > { %859 = vmatpush.bf16.msrb.mxu0 %v1907_v34 }
  0x4a   : > { %878 = vmatpush.bf16.msrb.mxu1 %v1971_v37 }
  0x4c   : > { %519 = vmatmul.bf16.gmra.mxu0 %v403_v53 }
  0x4d   : > { %538 = vmatmul.bf16.gmra.mxu1 %v403_v53  ;;  %860 = vmatpush.bf16.msrb.mxu0 %v1899_v46  ;;  %v1887_v53 = vor.u32 %v2239_v51, %v1886_v50 }
  0x4e   : > { %879 = vmatpush.bf16.msrb.mxu1 %v1963_v49 }
  0x4f   : > { %823 = vmatpush.bf16.msra.mxu2 %v1887_v53 }
  0x51   : > { %861 = vmatpush.bf16.msrb.mxu0 %v1891_v58 }
  0x52   : > { %880 = vmatpush.bf16.msrb.mxu1 %v1955_v62 }
  0x53   : > { %824 = vmatpush.bf16.msra.mxu2 %v1879_v2 }
  0x55   : > { %862 = vmatpush.bf16.msrb.mxu0 %v1883_v8 }
  0x56   : > { %881 = vmatpush.bf16.msrb.mxu1 %v1947_v12 }
  0x57   : > { %825 = vmatpush.bf16.msra.mxu2 %v1871_v17 }
  0x59   : > { %863 = vmatpush.bf16.msrb.mxu0 %v1875_v24 }
  0x5a   : > { %882 = vmatpush.bf16.msrb.mxu1 %v1939_v28 }
  0xb9   : > { %v515_v16 = vpop.f32.mrf.mxu0 }
  0xba   : > { %v3016_v21 = vadd.f32 %v515_v16, %v2987_v6  ;;  %v534_v22 = vpop.f32.mrf.mxu1 }
  0xbb   : > { %v3025_v27 = vadd.f32 %v534_v22, %v2995_v11 }
  0xbc   : > { %v544_v29 = vmul.f32 %v3016_v21, %v3016_v21 }
  0xbd   : > { %v545_v30 = vmul.f32 %v3025_v27, %v3025_v27 }
  0xbe   : > { %v552_v31 = vmul.f32 %v544_v29, %v3016_v21 }
  0xbf   : > { %v553_v32 = vmul.f32 %v545_v30, %v3025_v27 }
  0xc0   : > { %v560_v33 = vmul.f32 0.044715, %v552_v31 }
  0xc1   : > { %v561_v34 = vmul.f32 0.044715, %v553_v32  ;;  %v517_v35 = vpop.f32.mrf.mxu0 }
  0xc2   : > { %v568_v36 = vadd.f32 %v560_v33, %v3016_v21  ;;  %v518_v37 = vadd.f32 %v517_v35, %v2987_v6  ;;  %v536_v38 = vpop.f32.mrf.mxu1 }
  0xc3   : > { %v569_v39 = vadd.f32 %v561_v34, %v3025_v27  ;;  %v537_v40 = vadd.f32 %v536_v38, %v2995_v11 }
  0xc4   : > { %v546_v41 = vmul.f32 %v518_v37, %v518_v37  ;;  %v576_v42 = vmul.f32 0.7978846, %v568_v36 }
  0xc5   : > { %v547_v43 = vmul.f32 %v537_v40, %v537_v40  ;;  %v577_v44 = vmul.f32 0.7978846, %v569_v39 }
  0xc6   : > { %v554_v45 = vmul.f32 %v546_v41, %v518_v37  ;;  %2425 = vtanh.f32 %v576_v42 }
  0xc7   : > { %v555_v46 = vmul.f32 %v547_v43, %v537_v40  ;;  %2427 = vtanh.f32 %v577_v44 }
  0xc8   : > { %v562_v47 = vmul.f32 0.044715, %v554_v45 }
  0xc9   : > { %v563_v48 = vmul.f32 0.044715, %v555_v46  ;;  %v520_v49 = vpop.f32.mrf.mxu0 }
  0xca   : > { %v570_v50 = vadd.f32 %v562_v47, %v518_v37  ;;  %v3038_v51 = vadd.f32 %v520_v49, %v2987_v6  ;;  %v539_v52 = vpop.f32.mrf.mxu1 }
  0xcb   : > { %v571_v53 = vadd.f32 %v563_v48, %v537_v40  ;;  %v3041_v54 = vadd.f32 %v539_v52, %v2995_v11 }
  0xcc   : > { %v548_v55 = vmul.f32 %v3038_v51, %v3038_v51  ;;  %v578_v56 = vmul.f32 0.7978846, %v570_v50  ;;  %v2426_v59 = vpop.eup %2425 }
  0xcd   : > { %v549_v57 = vmul.f32 %v3041_v54, %v3041_v54  ;;  %v579_v58 = vmul.f32 0.7978846, %v571_v53  ;;  %v2428_v61 = vpop.eup %2427  ;;  %v592_v2 = vadd.f32 1.0, %v2426_v59  ;;  %v2110_v59 = vld [vmem:[%s3509_s5 + $0xe0] sm:$0xf] }
  0xce   : > { %v556_v60 = vmul.f32 %v548_v55, %v3038_v51  ;;  %2429 = vtanh.f32 %v578_v56  ;;  %v593_v7 = vadd.f32 1.0, %v2428_v61  ;;  %v2118_v55 = vld [vmem:[%s3509_s5 + $0xf0] sm:$0xf]  ;;  %v2297_v56 = vld [vmem:[%s3509_s5 + $0xf4] sm:$0xf0] }
  0xcf   : > { %v557_v62 = vmul.f32 %v549_v57, %v3041_v54  ;;  %2431 = vtanh.f32 %v579_v58  ;;  %v600_v17 = vmul.f32 0.5, %v592_v2  ;;  %v2120_v57 = vld [vmem:[%s3509_s5 + $0xf8] sm:$0xf0]  ;;  %v2294_v61 = vld [vmem:[%s3509_s5 + $0xe4] sm:$0xf] }
  0xd0   : > { %v564_v63 = vmul.f32 0.044715, %v556_v60  ;;  %v601_v22 = vmul.f32 0.5, %v593_v7  ;;  %v2295_v60 = vld [vmem:[%s3509_s5 + $0xe4] sm:$0xf0] }
  0xd1   : > { %v565_v0 = vmul.f32 0.044715, %v557_v62  ;;  %v522_v1 = vpop.f32.mrf.mxu0  ;;  %v608_v28 = vmul.f32 %v600_v17, %v3016_v21  ;;  %v2111_v62 = vor.u32 %v2295_v60, %v2110_v59  ;;  %v2281_v2 = vld [vmem:[%s3509_s5 + $0x74] sm:$0xf0]  ;;  %v2278_v17 = vld [vmem:[%s3509_s5 + $0x64] sm:$0xf] }
  0xd2   : > { %v572_v3 = vadd.f32 %v564_v63, %v3038_v51  ;;  %v523_v4 = vadd.f32 %v522_v1, %v2987_v6  ;;  %v541_v5 = vpop.f32.mrf.mxu1  ;;  %v609_v30 = vmul.f32 %v601_v22, %v3025_v27  ;;  %v2112_v63 = vld [vmem:[%s3509_s5 + $0xe8] sm:$0xf0]  ;;  %v2054_v1 = vld [vmem:[%s3509_s5 + $0x70] sm:$0xf]  ;;  %v2094_v22 = vld [vmem:[%s3509_s5 + $0xc0] sm:$0xf] }
  0xd3   : > { %v573_v8 = vadd.f32 %v565_v0, %v3041_v54  ;;  %v542_v9 = vadd.f32 %v541_v5, %v2995_v11  ;;  %v2115_v0 = vor.u32 %v2294_v61, %v2112_v63  ;;  %v2056_v5 = vld [vmem:[%s3509_s5 + $0x78] sm:$0xf0]  ;;  %v2284_v59 = vld [vmem:[%s3509_s5 + $0x94] sm:$0xf]  ;;  %v2014_v63 = vld [vmem:[%s3509_s5 + $0x20] sm:$0xf] }
  0xd4   : > { %v2430_v10 = vpop.eup %2429  ;;  %v550_v12 = vmul.f32 %v523_v4, %v523_v4  ;;  %v580_v13 = vmul.f32 0.7978846, %v572_v3  ;;  %v2280_v3 = vld [vmem:[%s3509_s5 + $0x74] sm:$0xf]  ;;  %v2072_v61 = vld [vmem:[%s3509_s5 + $0x98] sm:$0xf0] }
  0xd5   : > { %v2432_v14 = vpop.eup %2431  ;;  %v551_v15 = vmul.f32 %v542_v9, %v542_v9  ;;  %v594_v16 = vadd.f32 1.0, %v2430_v10  ;;  %v581_v18 = vmul.f32 0.7978846, %v573_v8  ;;  %v2059_v7 = vor.u32 %v2280_v3, %v2056_v5  ;;  %v2102_v8 = vld [vmem:[%s3509_s5 + $0xd0] sm:$0xf] }
  0xd6   : > { %v558_v19 = vmul.f32 %v550_v12, %v523_v4  ;;  %v595_v20 = vadd.f32 1.0, %v2432_v14  ;;  %2433 = vtanh.f32 %v580_v13  ;;  %v2292_v10 = vld [vmem:[%s3509_s5 + $0xd4] sm:$0xf]  ;;  %v2104_v13 = vld [vmem:[%s3509_s5 + $0xd8] sm:$0xf0] }
  0xd7   : > { %v559_v23 = vmul.f32 %v551_v15, %v542_v9  ;;  %v602_v24 = vmul.f32 0.5, %v594_v16  ;;  %2435 = vtanh.f32 %v581_v18  ;;  %1206 = vmatpush.bf16.msra.mxu0 %v2059_v7  ;;  %v2107_v14 = vor.u32 %v2292_v10, %v2104_v13  ;;  %v2046_v15 = vld [vmem:[%s3509_s5 + $0x60] sm:$0xf]  ;;  %v2279_v16 = vld [vmem:[%s3509_s5 + $0x64] sm:$0xf0] }
  0xd8   : > { %v566_v6 = vmul.f32 0.044715, %v558_v19  ;;  %v603_v25 = vmul.f32 0.5, %v595_v20  ;;  %v2047_v18 = vor.u32 %v2279_v16, %v2046_v15  ;;  %v2048_v19 = vld [vmem:[%s3509_s5 + $0x68] sm:$0xf0] }
  0xd9   : > { %v567_v26 = vmul.f32 0.044715, %v559_v23  ;;  %v610_v11 = vmul.f32 %v602_v24, %v518_v37  ;;  %v2051_v20 = vor.u32 %v2278_v17, %v2048_v19  ;;  %v2291_v23 = vld [vmem:[%s3509_s5 + $0xc4] sm:$0xf0]  ;;  %v2290_v24 = vld [vmem:[%s3509_s5 + $0xc4] sm:$0xf] }
  0xda   : > { %v574_v29 = vadd.f32 %v566_v6, %v523_v4  ;;  %v611_v31 = vmul.f32 %v603_v25, %v537_v40  ;;  %v2095_v6 = vor.u32 %v2291_v23, %v2094_v22  ;;  %v2096_v25 = vld [vmem:[%s3509_s5 + $0xc8] sm:$0xf0]  ;;  %v2283_v10 = vld [vmem:[%s3509_s5 + $0x84] sm:$0xf0]  ;;  %v2269_v19 = vld [vmem:[%s3509_s5 + $0x14] sm:$0xf0] }
  0xdb   : > { %v575_v32 = vadd.f32 %v567_v26, %v542_v9  ;;  %v616_v33 = vpack.c.bf16 %v610_v11, %v608_v28  ;;  %1207 = vmatpush.bf16.msra.mxu0 %v2051_v20  ;;  %v2099_v26 = vor.u32 %v2290_v24, %v2096_v25  ;;  %v2038_v28 = vld [vmem:[%s3509_s5 + $0x50] sm:$0xf]  ;;  %v2277_v11 = vld [vmem:[%s3509_s5 + $0x54] sm:$0xf0]  ;;  %v2064_v15 = vld [vmem:[%s3509_s5 + $0x88] sm:$0xf0] }
  0xdc   : > { %v617_v34 = vpack.c.bf16 %v611_v31, %v609_v30  ;;  %v582_v35 = vmul.f32 0.7978846, %v574_v29  ;;  %v2434_v38 = vpop.eup %2433  ;;  %v2276_v29 = vld [vmem:[%s3509_s5 + $0x54] sm:$0xf]  ;;  %v2039_v30 = vor.u32 %v2277_v11, %v2038_v28  ;;  %v2040_v31 = vld [vmem:[%s3509_s5 + $0x58] sm:$0xf0] }
  0xdd   : > { %826 = vmatmul.bf16.vlgmr.msra.gmra.mxu2 %v616_v33  ;;  %864 = vmatmul.bf16.vlgmr.msrb.gmra.mxu0 %v616_v33  ;;  %v583_v36 = vmul.f32 0.7978846, %v575_v32  ;;  %v2436_v39 = vpop.eup %2435  ;;  %v596_v21 = vadd.f32 1.0, %v2434_v38  ;;  %v2043_v32 = vor.u32 %v2276_v29, %v2040_v31  ;;  %v2086_v33 = vld [vmem:[%s3509_s5 + $0xb0] sm:$0xf] }
  0xde   : > { %845 = vmatmul.bf16.vlgmr.msra.gmra.mxu3 %v617_v34  ;;  %883 = vmatmul.bf16.vlgmr.msrb.gmra.mxu1 %v617_v34  ;;  %2437 = vtanh.f32 %v582_v35  ;;  %v597_v37 = vadd.f32 1.0, %v2436_v39  ;;  %v2289_v34 = vld [vmem:[%s3509_s5 + $0xb4] sm:$0xf0]  ;;  %v2288_v35 = vld [vmem:[%s3509_s5 + $0xb4] sm:$0xf] }
  0xdf   : > { %2439 = vtanh.f32 %v583_v36  ;;  %v604_v27 = vmul.f32 0.5, %v596_v21  ;;  %v2087_v36 = vor.u32 %v2289_v34, %v2086_v33  ;;  %v2088_v38 = vld [vmem:[%s3509_s5 + $0xb8] sm:$0xf0]  ;;  %1208 = vmatpush.bf16.msra.mxu0 %v2043_v32  ;;  %v2030_v21 = vld [vmem:[%s3509_s5 + $0x40] sm:$0xf] }
  0xe0   : > { %v605_v44 = vmul.f32 0.5, %v597_v37  ;;  %v2091_v39 = vor.u32 %v2288_v35, %v2088_v38  ;;  %v2275_v37 = vld [vmem:[%s3509_s5 + $0x44] sm:$0xf0]  ;;  %v2268_v20 = vld [vmem:[%s3509_s5 + $0x14] sm:$0xf] }
  0xe1   : > { %v612_v47 = vmul.f32 %v604_v27, %v3038_v51  ;;  %v2296_v51 = vld [vmem:[%s3509_s5 + $0xf4] sm:$0xf]  ;;  %v2032_v27 = vld [vmem:[%s3509_s5 + $0x48] sm:$0xf0]  ;;  %v2008_v23 = vld [vmem:[%s3509_s5 + $0x18] sm:$0xf0] }
  0xe2   : > { %v613_v49 = vmul.f32 %v605_v44, %v3041_v54  ;;  %v2119_v54 = vor.u32 %v2297_v56, %v2118_v55  ;;  %v2123_v58 = vor.u32 %v2296_v51, %v2120_v57  ;;  %v2078_v44 = vld [vmem:[%s3509_s5 + $0xa0] sm:$0xf]  ;;  %v2024_v51 = vld [vmem:[%s3509_s5 + $0x38] sm:$0xf0]  ;;  %v2070_v57 = vld [vmem:[%s3509_s5 + $0x90] sm:$0xf] }
  0xe3   : > { %v2267_v31 = vld [vmem:[%s3509_s5 + $0x4] sm:$0xf0]  ;;  %v2266_v32 = vld [vmem:[%s3509_s5 + $0x4] sm:$0xf]  ;;  %v2000_v35 = vld [vmem:[%s3509_s5 + $0x8] sm:$0xf0] }
  0xe4   : > { %v2438_v41 = vpop.eup %2437  ;;  %1187 = vmatpush.bf16.msrb.mxu3 %v2119_v54  ;;  %1225 = vmatpush.bf16.msra.mxu1 %v2123_v58  ;;  %v2285_v58 = vld [vmem:[%s3509_s5 + $0x94] sm:$0xf0] }
  0xe5   : > { %v2440_v42 = vpop.eup %2439  ;;  %v598_v43 = vadd.f32 1.0, %v2438_v41  ;;  %v2274_v41 = vld [vmem:[%s3509_s5 + $0x44] sm:$0xf]  ;;  %v2071_v60 = vor.u32 %v2285_v58, %v2070_v57 }
  0xe6   : > { %v599_v40 = vadd.f32 1.0, %v2440_v42  ;;  %v652_v42 = vld [vmem:[%s3531_s4] sm:$0x3] }
  0xe7   : > { %v606_v45 = vmul.f32 0.5, %v598_v43  ;;  %v2031_v43 = vor.u32 %v2275_v37, %v2030_v21  ;;  %v3189_v55 = vperm.slane %v652_v42, 1  ;;  %v3228_v13 = vperm.slane %v652_v42, 0 }
  0xe8   : > { %v607_v46 = vmul.f32 0.5, %v599_v40  ;;  %1188 = vmatpush.bf16.msrb.mxu3 %v2111_v62  ;;  %1226 = vmatpush.bf16.msra.mxu1 %v2115_v0  ;;  %v2035_v40 = vor.u32 %v2274_v41, %v2032_v27  ;;  %v2075_v62 = vor.u32 %v2284_v59, %v2072_v61  ;;  %v2271_v0 = vld [vmem:[%s3509_s5 + $0x24] sm:$0xf0]  ;;  %v2003_v37 = vor.u32 %v2266_v32, %v2000_v35  ;;  %v2312_v41 = vld [vmem:[%s3511_s7 + $0x70] sm:$0xff] }
  0xe9   : > { %v614_v48 = vmul.f32 %v606_v45, %v523_v4  ;;  %v2055_v4 = vor.u32 %v2281_v2, %v2054_v1  ;;  %v2287_v45 = vld [vmem:[%s3509_s5 + $0xa4] sm:$0xf0]  ;;  %v2270_v1 = vld [vmem:[%s3509_s5 + $0x24] sm:$0xf]  ;;  %v2015_v3 = vor.u32 %v2271_v0, %v2014_v63 }
  0xea   : > { %v615_v50 = vmul.f32 %v607_v46, %v542_v9  ;;  %v2293_v9 = vld [vmem:[%s3509_s5 + $0xd4] sm:$0xf0]  ;;  %v2286_v46 = vld [vmem:[%s3509_s5 + $0xa4] sm:$0xf]  ;;  %1209 = vmatpush.bf16.msra.mxu0 %v2035_v40 }
  0xeb   : > { %v618_v52 = vpack.c.bf16 %v614_v48, %v612_v47  ;;  %1168 = vmatpush.bf16.msrb.mxu2 %v2055_v4  ;;  %v2103_v12 = vor.u32 %v2293_v9, %v2102_v8  ;;  %v2079_v47 = vor.u32 %v2287_v45, %v2078_v44  ;;  %v2080_v48 = vld [vmem:[%s3509_s5 + $0xa8] sm:$0xf0]  ;;  %v2062_v9 = vld [vmem:[%s3509_s5 + $0x80] sm:$0xf]  ;;  %v2305_v40 = vld [vmem:[%s3511_s7 + $0x38] sm:$0xff] }
  0xec   : > { %v619_v53 = vpack.c.bf16 %v615_v50, %v613_v49  ;;  %1227 = vmatpush.bf16.msra.mxu1 %v2107_v14  ;;  %v2083_v49 = vor.u32 %v2286_v46, %v2080_v48  ;;  %v2022_v50 = vld [vmem:[%s3509_s5 + $0x30] sm:$0xf]  ;;  %v2016_v4 = vld [vmem:[%s3509_s5 + $0x28] sm:$0xf0]  ;;  %v2063_v14 = vor.u32 %v2283_v10, %v2062_v9  ;;  %v2309_v9 = vld [vmem:[%s3511_s7 + $0x58] sm:$0xff] }
  0xed   : > { %831 = vmatmul.bf16.gmra.mxu2 %v618_v52  ;;  %869 = vmatmul.bf16.gmra.mxu0 %v618_v52  ;;  %v2273_v52 = vld [vmem:[%s3509_s5 + $0x34] sm:$0xf0]  ;;  %v2019_v8 = vor.u32 %v2270_v1, %v2016_v4  ;;  %v2302_v10 = vld [vmem:[%s3511_s7 + $0x20] sm:$0xff] }
  0xee   : > { %850 = vmatmul.bf16.gmra.mxu3 %v619_v53  ;;  %888 = vmatmul.bf16.gmra.mxu1 %v619_v53  ;;  %v2272_v53 = vld [vmem:[%s3509_s5 + $0x34] sm:$0xf]  ;;  %v2023_v56 = vor.u32 %v2273_v52, %v2022_v50 }
  0xef   : > { %1189 = vmatpush.bf16.msrb.mxu3 %v2103_v12  ;;  %1169 = vmatpush.bf16.msrb.mxu2 %v2047_v18  ;;  %v2027_v54 = vor.u32 %v2272_v53, %v2024_v51  ;;  %v2282_v12 = vld [vmem:[%s3509_s5 + $0x84] sm:$0xf]  ;;  %v2006_v18 = vld [vmem:[%s3509_s5 + $0x10] sm:$0xf] }
  0xf0   : > { %1228 = vmatpush.bf16.msra.mxu1 %v2099_v26  ;;  %v2067_v17 = vor.u32 %v2282_v12, %v2064_v15  ;;  %v2007_v22 = vor.u32 %v2269_v19, %v2006_v18  ;;  %v2313_v26 = vld [vmem:[%s3511_s7 + $0x78] sm:$0xff]  ;;  %v2308_v19 = vld [vmem:[%s3511_s7 + $0x50] sm:$0xff] }
  0xf1   : > { %1210 = vmatpush.bf16.msra.mxu0 %v2027_v54  ;;  %v2310_v54 = vld [vmem:[%s3511_s7 + $0x60] sm:$0xff] }
  0xf3   : > { %1190 = vmatpush.bf16.msrb.mxu3 %v2095_v6  ;;  %1170 = vmatpush.bf16.msrb.mxu2 %v2039_v30  ;;  %v2011_v6 = vor.u32 %v2268_v20, %v2008_v23  ;;  %v1998_v30 = vld [vmem:[%s3509_s5] sm:$0xf] }
  0xf4   : > { %1229 = vmatpush.bf16.msra.mxu1 %v2091_v39  ;;  %v1999_v34 = vor.u32 %v2267_v31, %v1998_v30  ;;  %v2301_v31 = vld [vmem:[%s3511_s7 + $0x18] sm:$0xff] }
  0xf5   : > { %1211 = vmatpush.bf16.msra.mxu0 %v2019_v8 }
  0xf7   : > { %1191 = vmatpush.bf16.msrb.mxu3 %v2087_v36  ;;  %1171 = vmatpush.bf16.msrb.mxu2 %v2031_v43 }
  0xf8   : > { %1230 = vmatpush.bf16.msra.mxu1 %v2083_v49  ;;  %v2304_v49 = vld [vmem:[%s3511_s7 + $0x30] sm:$0xff] }
  0xf9   : > { %1212 = vmatpush.bf16.msra.mxu0 %v2011_v6 }
  0xfb   : > { %1192 = vmatpush.bf16.msrb.mxu3 %v2079_v47  ;;  %1172 = vmatpush.bf16.msrb.mxu2 %v2023_v56  ;;  %v2311_v47 = vld [vmem:[%s3511_s7 + $0x68] sm:$0xff] }
  0xfc   : > { %1231 = vmatpush.bf16.msra.mxu1 %v2075_v62  ;;  %v2303_v62 = vld [vmem:[%s3511_s7 + $0x28] sm:$0xff] }
  0xfd   : > { %1213 = vmatpush.bf16.msra.mxu0 %v2003_v37  ;;  %v2300_v37 = vld [vmem:[%s3511_s7 + $0x10] sm:$0xff] }
  0xff   : > { %1193 = vmatpush.bf16.msrb.mxu3 %v2071_v60  ;;  %1173 = vmatpush.bf16.msrb.mxu2 %v2015_v3 }
 0x100   : > { %1232 = vmatpush.bf16.msra.mxu1 %v2067_v17 }
 0x103   : > { %1194 = vmatpush.bf16.msrb.mxu3 %v2063_v14  ;;  %1174 = vmatpush.bf16.msrb.mxu2 %v2007_v22 }
 0x107   : > { %1404 = vmatpush.bf16.msra.mxu3 %v2313_v26  ;;  %1175 = vmatpush.bf16.msrb.mxu2 %v1999_v34 }
 0x10b   : > { %1405 = vmatpush.bf16.msra.mxu3 %v2312_v41  ;;  %1385 = vmatpush.bf16.msra.mxu2 %v2305_v40 }
 0x10f   : > { %1406 = vmatpush.bf16.msra.mxu3 %v2311_v47  ;;  %1386 = vmatpush.bf16.msra.mxu2 %v2304_v49 }
 0x113   : > { %1407 = vmatpush.bf16.msra.mxu3 %v2310_v54  ;;  %1387 = vmatpush.bf16.msra.mxu2 %v2303_v62  ;;  %v2299_v54 = vld [vmem:[%s3511_s7 + $0x8] sm:$0xff] }
 0x117   : > { %1408 = vmatpush.bf16.msra.mxu3 %v2309_v9  ;;  %1388 = vmatpush.bf16.msra.mxu2 %v2302_v10 }
 0x11b   : > { %1409 = vmatpush.bf16.msra.mxu3 %v2308_v19  ;;  %1389 = vmatpush.bf16.msra.mxu2 %v2301_v31 }
 0x11f   : > { %1390 = vmatpush.bf16.msra.mxu2 %v2300_v37 }
 0x123   : > { %1391 = vmatpush.bf16.msra.mxu2 %v2299_v54 }
 0x15a   : > { %v865_v2 = vpop.f32.mrf.mxu0 }
 0x15b   : > { %v866_v5 = vadd.f32 %v865_v2, %v3189_v55  ;;  %v884_v7 = vpop.f32.mrf.mxu1 }
 0x15d   : > { %v3233_v16 = vadd.f32 %v884_v7, %v866_v5 }
 0x15f   : > { %v895_v24 = vmul.f32 %v3233_v16, %v3233_v16 }
 0x160   : > { %v827_v25 = vpop.f32.mrf.mxu2 }
 0x161   : > { %v903_v28 = vmul.f32 %v895_v24, %v3233_v16  ;;  %v828_v11 = vadd.f32 %v827_v25, %v3228_v13  ;;  %v846_v29 = vpop.f32.mrf.mxu3 }
 0x162   : > { %v867_v33 = vpop.f32.mrf.mxu0 }
 0x163   : > { %v911_v36 = vmul.f32 0.044715, %v903_v28  ;;  %v3266_v38 = vadd.f32 %v846_v29, %v828_v11  ;;  %v868_v39 = vadd.f32 %v867_v33, %v3189_v55  ;;  %v886_v21 = vpop.f32.mrf.mxu1 }
 0x165   : > { %v919_v42 = vadd.f32 %v911_v36, %v3233_v16  ;;  %v894_v43 = vmul.f32 %v3266_v38, %v3266_v38  ;;  %v3275_v27 = vadd.f32 %v886_v21, %v868_v39 }
 0x167   : > { %v927_v44 = vmul.f32 0.7978846, %v919_v42  ;;  %v902_v45 = vmul.f32 %v894_v43, %v3266_v38  ;;  %v897_v46 = vmul.f32 %v3275_v27, %v3275_v27 }
 0x168   : > { %v829_v48 = vpop.f32.mrf.mxu2 }
 0x169   : > { %v910_v50 = vmul.f32 0.044715, %v902_v45  ;;  %v905_v52 = vmul.f32 %v897_v46, %v3275_v27  ;;  %v830_v53 = vadd.f32 %v829_v48, %v3228_v13  ;;  %v848_v56 = vpop.f32.mrf.mxu3  ;;  %2441 = vtanh.f32 %v927_v44  ;;  %v2306_v46 = vld [vmem:[%s3511_s7 + $0x40] sm:$0xff] }
 0x16a   : > { %v870_v51 = vpop.f32.mrf.mxu0 }
 0x16b   : > { %v918_v57 = vadd.f32 %v910_v50, %v3266_v38  ;;  %v913_v58 = vmul.f32 0.044715, %v905_v52  ;;  %v3295_v59 = vadd.f32 %v848_v56, %v830_v53  ;;  %v871_v60 = vadd.f32 %v870_v51, %v3189_v55  ;;  %v889_v61 = vpop.f32.mrf.mxu1 }
 0x16d   : > { %v926_v63 = vmul.f32 0.7978846, %v918_v57  ;;  %v921_v0 = vadd.f32 %v913_v58, %v3275_v27  ;;  %v896_v1 = vmul.f32 %v3295_v59, %v3295_v59  ;;  %v3304_v2 = vadd.f32 %v889_v61, %v871_v60 }
 0x16f   : > { %v929_v3 = vmul.f32 0.7978846, %v921_v0  ;;  %v904_v4 = vmul.f32 %v896_v1, %v3295_v59  ;;  %v899_v5 = vmul.f32 %v3304_v2, %v3304_v2  ;;  %v2442_v7 = vpop.eup %2441  ;;  %2443 = vtanh.f32 %v926_v63  ;;  %v2298_v0 = vld [vmem:[%s3511_s7] sm:$0xff] }
 0x170   : > { %v832_v8 = vpop.f32.mrf.mxu2  ;;  %v943_v25 = vadd.f32 1.0, %v2442_v7  ;;  %1392 = vmatpush.bf16.msra.mxu2 %v2298_v0 }
 0x171   : > { %2445 = vtanh.f32 %v929_v3  ;;  %v912_v12 = vmul.f32 0.044715, %v904_v4  ;;  %v907_v14 = vmul.f32 %v899_v5, %v3304_v2  ;;  %v833_v15 = vadd.f32 %v832_v8, %v3228_v13  ;;  %v851_v17 = vpop.f32.mrf.mxu3 }
 0x172   : > { %v872_v18 = vpop.f32.mrf.mxu0  ;;  %v951_v21 = vmul.f32 0.5, %v943_v25 }
 0x173   : > { %v920_v20 = vadd.f32 %v912_v12, %v3295_v59  ;;  %v915_v22 = vmul.f32 0.044715, %v907_v14  ;;  %v3321_v23 = vadd.f32 %v851_v17, %v833_v15  ;;  %v873_v24 = vadd.f32 %v872_v18, %v3189_v55  ;;  %v891_v6 = vpop.f32.mrf.mxu1  ;;  %v2307_v55 = vld [vmem:[%s3511_s7 + $0x48] sm:$0xff] }
 0x174   : > { %1410 = vmatpush.bf16.msra.mxu3 %v2307_v55  ;;  %v959_v50 = vmul.f32 %v951_v21, %v3233_v16 }
 0x175   : > { %v928_v26 = vmul.f32 0.7978846, %v920_v20  ;;  %v923_v28 = vadd.f32 %v915_v22, %v3304_v2  ;;  %v898_v11 = vmul.f32 %v3321_v23, %v3321_v23  ;;  %v3327_v29 = vadd.f32 %v891_v6, %v873_v24  ;;  %v2444_v30 = vpop.eup %2443 }
 0x176   : > { %v942_v45 = vadd.f32 1.0, %v2444_v30 }
 0x177   : > { %v2446_v32 = vpop.eup %2445  ;;  %2447 = vtanh.f32 %v928_v26  ;;  %v931_v33 = vmul.f32 0.7978846, %v923_v28  ;;  %v906_v34 = vmul.f32 %v898_v11, %v3321_v23  ;;  %v901_v35 = vmul.f32 %v3327_v29, %v3327_v29 }
 0x178   : > { %v834_v36 = vpop.f32.mrf.mxu2  ;;  %v945_v39 = vadd.f32 1.0, %v2446_v32  ;;  %v950_v60 = vmul.f32 0.5, %v942_v45  ;;  %1411 = vmatpush.bf16.msra.mxu3 %v2306_v46 }
 0x179   : > { %v914_v41 = vmul.f32 0.044715, %v906_v34  ;;  %v909_v42 = vmul.f32 %v901_v35, %v3327_v29  ;;  %v835_v43 = vadd.f32 %v834_v36, %v3228_v13  ;;  %v853_v40 = vpop.f32.mrf.mxu3  ;;  %2449 = vtanh.f32 %v931_v33 }
 0x17a   : > { %v953_v44 = vmul.f32 0.5, %v945_v39  ;;  %v958_v1 = vmul.f32 %v950_v60, %v3266_v38 }
 0x17b   : > { %v922_v47 = vadd.f32 %v914_v41, %v3321_v23  ;;  %v917_v48 = vmul.f32 0.044715, %v909_v42  ;;  %v854_v49 = vadd.f32 %v853_v40, %v835_v43 }
 0x17c   : > { %v961_v52 = vmul.f32 %v953_v44, %v3275_v27 }
 0x17d   : > { %v2448_v53 = vpop.eup %2447  ;;  %v930_v13 = vmul.f32 0.7978846, %v922_v47  ;;  %v925_v56 = vadd.f32 %v917_v48, %v3327_v29  ;;  %v900_v51 = vmul.f32 %v854_v49, %v854_v49 }
 0x17e   : > { %v967_v57 = vpack.c.bf16 %v961_v52, %v959_v50  ;;  %v944_v58 = vadd.f32 1.0, %v2448_v53 }
 0x17f   : > { %v933_v61 = vmul.f32 0.7978846, %v925_v56  ;;  %v908_v62 = vmul.f32 %v900_v51, %v854_v49  ;;  %2451 = vtanh.f32 %v930_v13  ;;  %v2450_v27 = vpop.eup %2449 }
 0x180   : > { %1195 = vmatmul.bf16.vlgmr.msrb.gmra.mxu3 %v967_v57  ;;  %1233 = vmatmul.bf16.vlgmr.msra.gmra.mxu1 %v967_v57  ;;  %v952_v16 = vmul.f32 0.5, %v944_v58  ;;  %v947_v7 = vadd.f32 1.0, %v2450_v27 }
 0x181   : > { %2453 = vtanh.f32 %v933_v61  ;;  %v916_v63 = vmul.f32 0.044715, %v908_v62  ;;  %v2424_v61 = vld [vmem:[%s3512_s8] ss:$0 sm:$0xff] }
 0x182   : > { %v960_v3 = vmul.f32 %v952_v16, %v3295_v59  ;;  %v955_v14 = vmul.f32 0.5, %v947_v7 }
 0x183   : > { %v924_v4 = vadd.f32 %v916_v63, %v854_v49 }
 0x184   : > { %v966_v5 = vpack.c.bf16 %v960_v3, %v958_v1  ;;  %v963_v38 = vmul.f32 %v955_v14, %v3304_v2  ;;  %v1002_v2 = vld [vmem:[%s3510_s6] sm:$0x3] }
 0x185   : > { %v932_v8 = vmul.f32 0.7978846, %v924_v4  ;;  %v2452_v9 = vpop.eup %2451  ;;  %v1005_v11 = vperm.slane %v1002_v2, 1  ;;  %v1004_v55 = vperm.slane %v1002_v2, 0 }
 0x186   : > { %1176 = vmatmul.bf16.vlgmr.msrb.gmra.mxu2 %v966_v5  ;;  %1214 = vmatmul.bf16.vlgmr.msra.gmra.mxu0 %v966_v5  ;;  %v946_v17 = vadd.f32 1.0, %v2452_v9 }
 0x187   : > { %v2454_v10 = vpop.eup %2453  ;;  %2455 = vtanh.f32 %v932_v8 }
 0x188   : > { %v949_v12 = vadd.f32 1.0, %v2454_v10  ;;  %v954_v22 = vmul.f32 0.5, %v946_v17 }
 0x18a   : > { %v957_v15 = vmul.f32 0.5, %v949_v12  ;;  %v962_v6 = vmul.f32 %v954_v22, %v3321_v23 }
 0x18c   : > { %v965_v59 = vmul.f32 %v957_v15, %v3327_v29 }
 0x18d   : > { %v2456_v18 = vpop.eup %2455 }
 0x18e   : > { %v969_v19 = vpack.c.bf16 %v965_v59, %v963_v38  ;;  %v948_v20 = vadd.f32 1.0, %v2456_v18 }
 0x190   : > { %1200 = vmatmul.bf16.gmra.mxu3 %v969_v19  ;;  %1238 = vmatmul.bf16.gmra.mxu1 %v969_v19  ;;  %v956_v24 = vmul.f32 0.5, %v948_v20 }
 0x192   : > { %v964_v25 = vmul.f32 %v956_v24, %v854_v49 }
 0x194   : > { %v968_v26 = vpack.c.bf16 %v964_v25, %v962_v6 }
 0x196   : > { %1181 = vmatmul.bf16.gmra.mxu2 %v968_v26  ;;  %1219 = vmatmul.bf16.gmra.mxu0 %v968_v26 }
 0x1a0   : > { %1412 = vmatmul.bf16.vlgmr.msra.gmra.mxu3 %v967_v57 }
 0x1a6   : > { %1393 = vmatmul.bf16.vlgmr.msra.gmra.mxu2 %v966_v5 }
 0x1b0   : > { %1417 = vmatmul.bf16.gmra.mxu3 %v969_v19 }
 0x1b6   : > { %1398 = vmatmul.bf16.gmra.mxu2 %v968_v26 }
 0x1fd   : > { %v1234_v28 = vpop.f32.mrf.mxu1 }
 0x203   : > { %v1196_v29 = vpop.f32.mrf.mxu3  ;;  %v1215_v30 = vpop.f32.mrf.mxu0 }
 0x204   : > { %v1216_v31 = vadd.f32 %v1215_v30, %v1005_v11 }
 0x205   : > { %v1236_v32 = vpop.f32.mrf.mxu1 }
 0x206   : > { %v1235_v23 = vadd.f32 %v1234_v28, %v1216_v31 }
 0x208   : > { %1246 = vst.msk [vmem:[%s3368_s27 + $0x8] sm:$0xff] %vm1245_vm0, %v1235_v23 }
 0x209   : > { %v1177_v33 = vpop.f32.mrf.mxu2 }
 0x20a   : > { %v1178_v34 = vadd.f32 %v1177_v33, %v1004_v55 }
 0x20b   : > { %v1198_v35 = vpop.f32.mrf.mxu3  ;;  %v1217_v36 = vpop.f32.mrf.mxu0 }
 0x20c   : > { %v1197_v39 = vadd.f32 %v1196_v29, %v1178_v34  ;;  %v1218_v21 = vadd.f32 %v1217_v36, %v1005_v11 }
 0x20d   : > { %v1239_v42 = vpop.f32.mrf.mxu1 }
 0x20e   : > { %1244 = vst [vmem:[%s3368_s27] sm:$0xff] %v1197_v39  ;;  %v1237_v37 = vadd.f32 %v1236_v32, %v1218_v21 }
 0x210   : > { %1248 = vst.msk [vmem:[%s3368_s27 + $0x18] sm:$0xff] %vm1245_vm0, %v1237_v37 }
 0x211   : > { %v1179_v41 = vpop.f32.mrf.mxu2 }
 0x212   : > { %v1180_v43 = vadd.f32 %v1179_v41, %v1004_v55 }
 0x213   : > { %v1201_v40 = vpop.f32.mrf.mxu3  ;;  %v1220_v44 = vpop.f32.mrf.mxu0 }
 0x214   : > { %v1199_v45 = vadd.f32 %v1198_v35, %v1180_v43  ;;  %v1221_v46 = vadd.f32 %v1220_v44, %v1005_v11 }
 0x215   : > { %v1241_v56 = vpop.f32.mrf.mxu1 }
 0x216   : > { %1247 = vst [vmem:[%s3368_s27 + $0x10] sm:$0xff] %v1199_v45  ;;  %v1240_v47 = vadd.f32 %v1239_v42, %v1221_v46 }
 0x218   : > { %1250 = vst.msk [vmem:[%s3368_s27 + $0x28] sm:$0xff] %vm1245_vm0, %v1240_v47 }
 0x219   : > { %v1182_v48 = vpop.f32.mrf.mxu2 }
 0x21a   : > { %v1183_v49 = vadd.f32 %v1182_v48, %v1004_v55 }
 0x21b   : > { %v1203_v50 = vpop.f32.mrf.mxu3  ;;  %v1222_v52 = vpop.f32.mrf.mxu0 }
 0x21c   : > { %v1202_v53 = vadd.f32 %v1201_v40, %v1183_v49  ;;  %v1223_v13 = vadd.f32 %v1222_v52, %v1005_v11 }
 0x21e   : > { %1249 = vst [vmem:[%s3368_s27 + $0x20] sm:$0xff] %v1202_v53  ;;  %v1242_v51 = vadd.f32 %v1241_v56, %v1223_v13 }
 0x220   : > { %1252 = vst.msk [vmem:[%s3368_s27 + $0x38] sm:$0xff] %vm1245_vm0, %v1242_v51 }
 0x221   : > { %v1184_v54 = vpop.f32.mrf.mxu2 }
 0x222   : > { %v1185_v57 = vadd.f32 %v1184_v54, %v1004_v55 }
 0x223   : > { %v1413_v60 = vpop.f32.mrf.mxu3 }
 0x224   : > { %v1204_v58 = vadd.f32 %v1203_v50, %v1185_v57 }
 0x226   : > { %1251 = vst [vmem:[%s3368_s27 + $0x30] sm:$0xff] %v1204_v58 }
 0x229   : > { %v1394_v62 = vpop.f32.mrf.mxu2 }
 0x22a   : > { %v1395_v16 = vadd.f32 %v2424_v61, %v1394_v62 }
 0x22b   : > { %v1415_v0 = vpop.f32.mrf.mxu3 }
 0x22c   : > { %v1414_v27 = vadd.f32 %v1413_v60, %v1395_v16 }
 0x22e   : > { %v2188_v63 = vmul.f32 -1.442695, %v1414_v27 }
 0x230   : > { %2457 = vpow2.f32 %v2188_v63 }
 0x231   : > { %v1396_v1 = vpop.f32.mrf.mxu2 }
 0x232   : > { %v1397_v3 = vadd.f32 %v2424_v61, %v1396_v1 }
 0x233   : > { %v1418_v9 = vpop.f32.mrf.mxu3 }
 0x234   : > { %v1416_v4 = vadd.f32 %v1415_v0, %v1397_v3 }
 0x236   : > { %v2458_v5 = vpop.eup %2457  ;;  %v2189_v7 = vmul.f32 -1.442695, %v1416_v4 }
 0x237   : > { %v1435_v8 = vadd.f32 1.0, %v2458_v5 }
 0x238   : > { %2459 = vpow2.f32 %v2189_v7 }
 0x239   : > { %2461 = vrcp.f32 %v1435_v8  ;;  %v1399_v10 = vpop.f32.mrf.mxu2  ;;  %v1450_v24 = vand.u32 2147483648, %v1435_v8  ;;  %v1448_v26 = vand.u32 2147483647, %v1435_v8  ;;  %vm1444_vm2 = vweird.f32 %v1435_v8 }
 0x23a   : > { %v1400_v12 = vadd.f32 %v2424_v61, %v1399_v10 }
 0x23b   : > { %v1420_v6 = vpop.f32.mrf.mxu3  ;;  %v1451_v31 = vor.u32 1.1754944e-38, %v1450_v24  ;;  %vm1449_vm5 = vcmp.eq.f32.partialorder %v1448_v26, 8.507059e+37 }
 0x23c   : > { %v1419_v14 = vadd.f32 %v1418_v9, %v1400_v12 }
 0x23e   : > { %v2460_v15 = vpop.eup %2459  ;;  %v2190_v17 = vmul.f32 -1.442695, %v1419_v14 }
 0x23f   : > { %v2462_v38 = vpop.eup %2461  ;;  %v1436_v59 = vadd.f32 1.0, %v2460_v15 }
 0x240   : > { %v1440_v18 = vmul.f32 %v2462_v38, %v1435_v8  ;;  %2463 = vpow2.f32 %v2190_v17  ;;  %vm1445_vm1 = vweird.f32 %v2462_v38 }
 0x241   : > { %2465 = vrcp.f32 %v1436_v59  ;;  %v1401_v19 = vpop.f32.mrf.mxu2  ;;  %vm1446_vm3 = vmor %vm1444_vm2, %vm1445_vm1  ;;  %v1465_v35 = vand.u32 2147483648, %v1436_v59  ;;  %v1463_v39 = vand.u32 2147483647, %v1436_v59  ;;  %vm1459_vm7 = vweird.f32 %v1436_v59 }
 0x242   : > { %v1441_v20 = vsub.f32 1.0, %v1440_v18  ;;  %v1402_v22 = vadd.f32 %v2424_v61, %v1401_v19 }
 0x243   : > { %v1466_v42 = vor.u32 1.1754944e-38, %v1465_v35  ;;  %vm1464_vm9 = vcmp.eq.f32.partialorder %v1463_v39, 8.507059e+37 }
 0x244   : > { %v1442_v25 = vmul.f32 %v2462_v38, %v1441_v20  ;;  %v1421_v2 = vadd.f32 %v1420_v6, %v1402_v22 }
 0x246   : > { %v2464_v28 = vpop.eup %2463  ;;  %v1443_v11 = vadd.f32 %v2462_v38, %v1442_v25  ;;  %v2191_v29 = vmul.f32 -1.442695, %v1421_v2 }
 0x247   : > { %v2466_v30 = vpop.eup %2465  ;;  %v1437_v23 = vadd.f32 1.0, %v2464_v28 }
 0x248   : > { %v1447_v55 = vsel %vm1446_vm3, %v2462_v38, %v1443_v11  ;;  %v1455_v32 = vmul.f32 %v2466_v30, %v1436_v59  ;;  %2467 = vpow2.f32 %v2191_v29  ;;  %vm1460_vm6 = vweird.f32 %v2466_v30 }
 0x249   : > { %v1452_v33 = vsel %vm1449_vm5, %v1451_v31, %v1447_v55  ;;  %2469 = vrcp.f32 %v1437_v23  ;;  %vm1461_vm8 = vmor %vm1459_vm7, %vm1460_vm6  ;;  %v1480_v47 = vand.u32 2147483648, %v1437_v23  ;;  %v1478_v49 = vand.u32 2147483647, %v1437_v23 }
 0x24a   : > { %1500 = vst.msk [vmem:[%s3386_s15] sm:$0xff] %vm1499_vm4, %v1452_v33  ;;  %v1456_v34 = vsub.f32 1.0, %v1455_v32  ;;  %vm1474_vm11 = vweird.f32 %v1437_v23 }
 0x24b   : > { %v1481_v53 = vor.u32 1.1754944e-38, %v1480_v47  ;;  %vm1479_vm13 = vcmp.eq.f32.partialorder %v1478_v49, 8.507059e+37 }
 0x24c   : > { %v1457_v36 = vmul.f32 %v2466_v30, %v1456_v34 }
 0x24e   : > { %v2468_v21 = vpop.eup %2467  ;;  %v1458_v37 = vadd.f32 %v2466_v30, %v1457_v36 }
 0x24f   : > { %v2470_v41 = vpop.eup %2469  ;;  %v1438_v43 = vadd.f32 1.0, %v2468_v21 }
 0x250   : > { %v1462_v40 = vsel %vm1461_vm8, %v2466_v30, %v1458_v37  ;;  %v1470_v44 = vmul.f32 %v2470_v41, %v1437_v23  ;;  %vm1475_vm10 = vweird.f32 %v2470_v41 }
 0x251   : > { %v1467_v45 = vsel %vm1464_vm9, %v1466_v42, %v1462_v40  ;;  %2471 = vrcp.f32 %v1438_v43  ;;  %vm1476_vm12 = vmor %vm1474_vm11, %vm1475_vm10  ;;  %v1495_v57 = vand.u32 2147483648, %v1438_v43  ;;  %v1493_v60 = vand.u32 2147483647, %v1438_v43 }
 0x252   : > { %1501 = vst.msk [vmem:[%s3386_s15 + $0x8] sm:$0xff] %vm1499_vm4, %v1467_v45  ;;  %v1471_v46 = vsub.f32 1.0, %v1470_v44  ;;  %vm1489_vm15 = vweird.f32 %v1438_v43 }
 0x253   : > { %v1496_v62 = vor.u32 1.1754944e-38, %v1495_v57  ;;  %vm1494_vm1 = vcmp.eq.f32.partialorder %v1493_v60, 8.507059e+37 }
 0x254   : > { %v1472_v48 = vmul.f32 %v2470_v41, %v1471_v46 }
 0x256   : > { %v1473_v50 = vadd.f32 %v2470_v41, %v1472_v48 }
 0x257   : > { %v2472_v52 = vpop.eup %2471 }
 0x258   : > { %v1477_v13 = vsel %vm1476_vm12, %v2470_v41, %v1473_v50  ;;  %v1485_v56 = vmul.f32 %v2472_v52, %v1438_v43  ;;  %vm1490_vm14 = vweird.f32 %v2472_v52 }
 0x259   : > { %v1482_v51 = vsel %vm1479_vm13, %v1481_v53, %v1477_v13  ;;  %vm1491_vm0 = vmor %vm1489_vm15, %vm1490_vm14 }
 0x25a   : > { %1502 = vst.msk [vmem:[%s3386_s15 + $0x10] sm:$0xff] %vm1499_vm4, %v1482_v51  ;;  %v1486_v54 = vsub.f32 1.0, %v1485_v56 }
 0x25c   : > { %v1487_v58 = vmul.f32 %v2472_v52, %v1486_v54 }
 0x25e   : > { %v1488_v61 = vadd.f32 %v2472_v52, %v1487_v58  ;;  %1515 = sbr.rel (!%p2708_p5) target bundleno = 643 (0x283), region = 60 }
 0x260   : > { %v1492_v16 = vsel %vm1491_vm0, %v2472_v52, %v1488_v61 }
 0x261   : > { %v1497_v27 = vsel %vm1494_vm1, %v1496_v62, %v1492_v16 }
 0x262   : > { %1503 = vst.msk [vmem:[%s3386_s15 + $0x18] sm:$0xff] %vm1499_vm4, %v1497_v27 }
 0x263   : > { %s3544_s30 = smov (!%p1518_p11, %s1517_s30), 4 }
 0x264   : > { %s2314_s12 = sshll.u32 %s3544_s30, 4 }
 0x265   : > { %s1522_s20 = ssub.s32 64, %s2314_s12 }
 0x266   : > { %s1523_s25 = sshll.u32 %s1522_s20, 4 }
 0x267   : > { %1524 = vsyncadd %s3516_s22, %s1523_s25  ;;  %p3405_p12 = scmp.ne.s32.totalorder %s2314_s12, 0  ;;  %s2316_s28 = sshll.u32 %s2691_s17, 6 }
 0x268   : > { %s1528_s0 = scalar_lea.hbm %s3513_s9, %s2316_s28  ;;  %s1530_s1 = sshll.u32 %s3368_s27, 4  ;;  %s3414_s1 = int_to_ptr.vmem [resolvable:$true] %s1530_s1 }
 0x269   : > { %s1532_s20 = sshll.u32 %s1528_s0, 4  ;;  %s3517_s25 = sshll.u32 %s3544_s30, 8  ;;  %s3416_s20 = int_to_ptr.hbm [resolvable:$true] %s1532_s20 }
 0x26a   : > { %s2473_s22 = sshra.s32 %s3414_s1, 4  ;;  %s2475_s12 = sshrl.u32 %s3517_s25, 4  ;;  %s2474_s22 = int_to_ptr.vmem [resolvable:$true] %s2473_s22 }
 0x26b   : > { %s2480_s2 = scalar_lea.vmem %s2474_s22, %s2475_s12  ;;  %s2612_s3 = smov [#allocation2]  }
 0x26c   : > { %p2481_p13 = scmp.ne.s32.totalorder %s2474_s22, %s2480_s2  ;;  %s2484_s11 = scalar_lea.vmem %s2612_s3, 128 }
 0x26d   : > { %p2486_p2 = scmp.lt.s32.totalorder %s2484_s11, %s2480_s2 }
 0x26e   : > { %p2482_p0 = pnand %p2481_p13, %p3405_p12 }
 0x270   : > { %p2483_p1 = pneg %p2482_p0 }
 0x272   : > { %p2488_p3 = pnand %p2486_p2, %p2483_p1 }
 0x274   : > { %2491 = shalt.err (!%p2488_p3)
}
 0x275   : > { %s2492_s0 = sshra.s32 %s3416_s20, 4  ;;  %s2503_s22 = scalar_lea.hbm %s3513_s9, 112  ;;  %s2493_s0 = int_to_ptr.hbm [resolvable:$true] %s2492_s0 }
 0x276   : > { %s2499_s27 = scalar_lea.hbm %s2493_s0, %s2475_s12  ;;  %p2504_p9 = scmp.lt.s32.totalorder %s2493_s0, %s3513_s9 }
 0x277   : > { %p2500_p4 = scmp.ne.s32.totalorder %s2493_s0, %s2499_s27  ;;  %p2505_p10 = scmp.lt.s32.totalorder %s2503_s22, %s2499_s27 }
 0x279   : > { %p2501_p7 = pnand %p2500_p4, %p3405_p12  ;;  %p2506_p11 = por %p2505_p10, %p2504_p9 }
 0x27b   : > { %p2502_p8 = pneg %p2501_p7 }
 0x27d   : > { %p2507_p13 = pnand %p2506_p11, %p2502_p8 }
 0x27f   : > { %2510 = shalt.err (!%p2507_p13)
}
 0x280   : > { %s2613_s2 = smov 256   ;;  %s2614_s3 = smov 16  }
 0x281   : > { %s3533_s12 = scalar_lea.sflag [#allocation3], %s3359_s18  ;;  %s3534_s11 = sshll.u32 %s3544_s30, 8 }
 0x282   : > { %1538 = dma.vmem_to_hbm [thread:$0]  (%p3405_p12), %s3414_s1, %s3534_s11, %s3416_s20, %s3533_s12, %s2613_s2, %s2613_s2, %s2614_s3  }
 0x283 PF: > { %1541 = sbr.rel (!%p2708_p5) target bundleno = 687 (0x2af), region = 64  ;;  %s1543_s4 = ssub.s32 (%p2708_p5), 7, %s2767_s21 }
 0x284   : > { %s2317_s25 = sshll.u32 (%p2708_p5), %s2691_s17, 5  ;;  %p1544_p0 = scmp.lt.s32.totalorder (%p2708_p5), %s1543_s4, 4 }
 0x285   : > { %s3448_s28 = scalar_lea.vmem (%p2708_p5), %s3514_s10, %s2317_s25  }
 0x288   : > { %s3546_s4 = smov (!%p1544_p0, %s1543_s4), 4 }
 0x289   : > { %s2203_s18 = sshll.u32 %s3546_s4, 3 }
 0x28a   : > { %p2206_p1 = scmp.eq.s32.totalorder %s2203_s18, 0 }
 0x28b   : > { %s3454_s1 = sshrl.u32 (!%p2206_p1), %s3546_s4, 2 }
 0x28c   : > { %1552 = sbr.rel (%p2206_p1) target bundleno = 687 (0x2af), region = 68  ;;  %p2207_p5 = scmp.le.s32.totalorder (!%p2206_p1), %s3454_s1, 0 }
 0x291   : > { %1743 = sbr.rel (%p2207_p5) target bundleno = 670 (0x29e), region = 157  ;;  %s3535_s17 = smov (!%p2207_p5), %s3448_s28 }
 0x292   : > { %s3536_s23 = smov (!%p2207_p5), %s3386_s15  ;;  %s3463_s21 = smov (!%p2207_p5), 0  }
 0x293   : > { %s2592_s30 = smov (!%p2207_p5), 0  }
 0x296 LB: >> { %v1621_v63 = vld [vmem:[%s2586_s23] sm:$0xff]  ;;  %v1623_v0 = vld [vmem:[%s2586_s23 + $0x8] sm:$0xff]  ;;  %v1625_v1 = vld [vmem:[%s2586_s23 + $0x10] sm:$0xff]  ;;  %s1629_s26 = sadd.s32 1, %s2590_s21  ;;  %s1615_s30 = sadd.s32 1, %s2594_s30   ;;  %s2594_s30 = sphi %s2592_s30, %s1615_s30   ;;  %s2590_s21 = sphi %s3463_s21, %s3537_s21   ;;  %s2586_s23 = sphi %s3536_s23, %s1634_s23   ;;  %s2582_s17 = sphi %s3535_s17, %s1635_s17  }
 0x297   : >> { %1622 = vst [vmem:[%s2582_s17] sm:$0xff] %v1621_v63  ;;  %v1627_v3 = vld [vmem:[%s2586_s23 + $0x18] sm:$0xff]  ;;  %p1630_p12 = scmp.ge.s32.totalorder %s1629_s26, %s3454_s1  ;;  %p1614_p2 = scmp.ge.s32.totalorder %s1615_s30, %s3454_s1 }
 0x298   : >> { %1624 = vst [vmem:[%s2582_s17 + $0x8] sm:$0xff] %v1623_v0 }
 0x299   : >> { %1626 = vst [vmem:[%s2582_s17 + $0x10] sm:$0xff] %v1625_v1  ;;  %s3548_s26 = smov (%p1630_p12, %s1629_s26), 0  ;;  %1617 = sbr.rel (!%p1614_p2) target bundleno = 662 (0x296), region = 163 }
 0x29a   : >> { %1628 = vst [vmem:[%s2582_s17 + $0x18] sm:$0xff] %v1627_v3  ;;  %s2208_s20 = sshll.u32 %s3548_s26, 5  ;;  %s3537_s21 = smov %s3548_s26 }
 0x29b   : >> { %s1634_s23 = scalar_lea.vmem %s3386_s15, %s2208_s20 [#allocation4]   ;;  %s1635_s17 = scalar_lea.vmem %s3448_s28, %s2208_s20  }
 0x29e PF: > { %s3479_s29 = sand.u32 3, %s3546_s4   ;;  %s2318_s22 = sshll.u32 %s3454_s1, 5 }
 0x29f   : > { %s1640_s2 = scalar_lea.vmem %s3386_s15, %s2318_s22 [#allocation4]   ;;  %s1642_s3 = scalar_lea.vmem %s3448_s28, %s2318_s22  }
 0x2a0   : > { %p2213_p3 = scmp.le.s32.totalorder %s3479_s29, 0 }
 0x2a1   : > { %s2596_s12 = smov (!%p2213_p3), %s1642_s3   ;;  %s2600_s11 = smov (!%p2213_p3), %s1640_s2  }
 0x2a2   : > { %1757 = sbr.rel (%p2213_p3) target bundleno = 687 (0x2af), region = 168  ;;  %s2604_s25 = smov (!%p2213_p3), 0  }
 0x2a3   : > { %s2608_s0 = smov (!%p2213_p3), 0  }
 0x2a7 LB: >> { %v1652_v4 = vld [vmem:[%s2602_s11] sm:$0xff]  ;;  %s1654_s4 = sadd.s32 1, %s2606_s25  ;;  %s1646_s0 = sadd.s32 1, %s2610_s0   ;;  %s2610_s0 = sphi %s2608_s0, %s1646_s0   ;;  %s2606_s25 = sphi %s2604_s25, %s2605_s25   ;;  %s2602_s11 = sphi %s2600_s11, %s1659_s11   ;;  %s2598_s12 = sphi %s2596_s12, %s1660_s12  }
 0x2a8   : >> { %1653 = vst [vmem:[%s2598_s12] sm:$0xff] %v1652_v4  ;;  %p1655_p4 = scmp.ge.s32.totalorder %s1654_s4, %s3479_s29  ;;  %p1645_p7 = scmp.ge.s32.totalorder %s1646_s0, %s3479_s29 }
 0x2aa   : >> { %s3550_s4 = smov (%p1655_p4, %s1654_s4), 0  ;;  %1648 = sbr.rel (!%p1645_p7) target bundleno = 679 (0x2a7), region = 174 }
 0x2ab   : >> { %s2214_s15 = sshll.u32 %s3550_s4, 3  ;;  %s2605_s25 = smov %s3550_s4  }
 0x2ac   : >> { %s1659_s11 = scalar_lea.vmem %s1640_s2, %s2214_s15 [#allocation4]   ;;  %s1660_s12 = scalar_lea.vmem %s1642_s3, %s2214_s15  }
 0x2af PF: > { %p2325_p8 = scmp.ge.s32.totalorder %s2578_s16, 2  ;;  %s1672_s27 = sand.u32 1, %s2566_s13  }
 0x2b0   : > { %s1673_s28 = scalar_lea.sflag [#allocation3], %s1672_s27 }
 0x2b1   : > { %p2322_p9 = pnand %p2325_p8, %p2712_p6 }
 0x2b3   : > { %p2323_p10 = pneg %p2322_p9 }
 0x2b5   : > { %2561 = dma.done.wait (%p2323_p10), %s1673_s28, 1024  }
 0x2b6   : > { %2563 = vsyncadd (%p2323_p10), %s1673_s28, 4294966272  ;;  %s3538_s18 = sld [smem:[#allocation6_spill]]  ;;  %p21_p11 = scmp.ge.s32.totalorder %s2695_s19, 4  }
 0x2b7   : > { %s3539_s15 = sld [smem:[#allocation7_spill]]  ;;  %s3540_s13 = smov %s2570_s14 }
 0x2b8   : > { %s3542_s16 = smov %s2695_s19  ;;  %23 = sbr.rel (!%p21_p11) target bundleno = 9 (0x9), region = 185 }
 0x2bc   : > { %s3541_s14 = smov %s3538_s18 }
 0x2bd   :  { %1686 = vsyncpa [#allocation3], 1 }
 0x2be   :  { %1688 = vsyncpa [#allocation3 + $0x1], 1 }

</bundles_post_ra>
